<compile_context>
chip_gen: v5e
topology: v5e:2x2
jax: 0.10.0
libtpu: 0.0.40
codegen_flags: <defaults>
</compile_context>

<pallas_src>
import functools

import jax
import jax.numpy as jnp
from jax.experimental import pallas as pl
from jax.experimental.pallas import tpu as pltpu

MIN_LOGVAR = -10.0
MAX_LOGVAR = 5.0


def _round_up(n, m):
    return ((n + m - 1) // m) * m


def _fused_ensemble_kernel(x_ref, w1_ref, b1_ref, w2_ref, b2_ref, w3_ref,
                           b3_ref, out_ref, *, num_models):
    # x:  (bt, in_dim)                      (f32 or bf16)
    # w1: (in_dim, MHp)    b1: (1, MHp)     (biases always f32)
    # w2: (MHp,   MHp)     b2: (1, MHp)     (w2/w3 are block-diagonal over models)
    # w3: (MHp,   OUTp)    b3: (1, OUTp)
    # out: (bt, OUTp) -- cols [0,M) means, [M,2M) constrained logvars, rest pad.
    x = x_ref[...]

    h1 = jnp.dot(x, w1_ref[...], preferred_element_type=jnp.float32) + b1_ref[...]
    h1 = h1 * jax.nn.sigmoid(h1)                       # SiLU in f32

    h2 = jnp.dot(h1.astype(w2_ref.dtype), w2_ref[...],
                 preferred_element_type=jnp.float32) + b2_ref[...]
    h2 = h2 * jax.nn.sigmoid(h2)                       # SiLU in f32

    pred = jnp.dot(h2.astype(w3_ref.dtype), w3_ref[...],
                   preferred_element_type=jnp.float32) + b3_ref[...]

    # Constrained logvar (applied only to the logvar columns), f32 softplus.
    clv = MAX_LOGVAR - jax.nn.softplus(MAX_LOGVAR - pred)
    clv = MIN_LOGVAR + jax.nn.softplus(clv - MIN_LOGVAR)
    col = jax.lax.broadcasted_iota(jnp.int32, pred.shape, 1)
    is_logvar = jnp.logical_and(col >= num_models, col < 2 * num_models)
    out_ref[...] = jnp.where(is_logvar, clv, pred)


def pack_params(params, use_bf16=True):
    """Fuse the M stacked MLPs along the lane axis: concat layer-1 weights,
    build block-diagonal layer-2/3 weights, lane-pad to multiples of 128, and
    optionally cast the matmul operands to bf16 (biases stay f32)."""
    w1, b1, w2, b2, w3, b3 = (params["w1"], params["b1"], params["w2"],
                              params["b2"], params["w3"], params["b3"])
    M, in_dim, H = w1.shape
    MH = M * H
    MHp = _round_up(MH, 128)
    OUTp = _round_up(max(2 * M, 128), 128)
    wdt = jnp.bfloat16 if use_bf16 else jnp.float32

    # Layer 1: concat models along lanes -> (in_dim, M*H).
    w1c = jnp.transpose(w1, (1, 0, 2)).reshape(in_dim, MH)
    w1c = jnp.pad(w1c, ((0, 0), (0, MHp - MH)))
    b1c = jnp.pad(b1.reshape(1, MH), ((0, 0), (0, MHp - MH)))

    # Layer 2: block-diagonal (M*H, M*H).
    w2bd = jax.scipy.linalg.block_diag(*[w2[m] for m in range(M)])
    w2bd = jnp.pad(w2bd, ((0, MHp - MH), (0, MHp - MH)))
    b2c = jnp.pad(b2.reshape(1, MH), ((0, 0), (0, MHp - MH)))

    # Layer 3: block-diagonal; means in cols [0,M), logvars in cols [M,2M).
    w3_mean = jax.scipy.linalg.block_diag(*[w3[m, :, 0:1] for m in range(M)])
    w3_lv = jax.scipy.linalg.block_diag(*[w3[m, :, 1:2] for m in range(M)])
    w3c = jnp.concatenate([w3_mean, w3_lv], axis=1)               # (MH, 2M)
    w3c = jnp.pad(w3c, ((0, MHp - MH), (0, OUTp - 2 * M)))
    b3c = jnp.concatenate([b3[:, 0, 0], b3[:, 0, 1]])[None, :]    # (1, 2M)
    b3c = jnp.pad(b3c, ((0, 0), (0, OUTp - 2 * M)))

    return {
        "num_models": M,
        "in_dim": in_dim,
        "compute_dtype": wdt,
        "w1": w1c.astype(wdt), "b1": b1c.astype(jnp.float32),
        "w2": w2bd.astype(wdt), "b2": b2c.astype(jnp.float32),
        "w3": w3c.astype(wdt), "b3": b3c.astype(jnp.float32),
    }


def factorized_ensemble_forward(x, packed):
    """x: (B, in_dim) f32.  packed: output of pack_params.
    Returns (means, logvars), each of shape (B, M) with M = dims*ensemble."""
    M = packed["num_models"]
    in_dim = packed["in_dim"]
    w1, b1, w2, b2, w3, b3 = (packed["w1"], packed["b1"], packed["w2"],
                              packed["b2"], packed["w3"], packed["b3"])
    MHp = w1.shape[1]
    OUTp = w3.shape[1]

    B = x.shape[0]
    # Batch tiling: single step for small B; 512-row tiles (parallel grid axis
    # -> sharded across TensorCores on megacore/v7x) for large B.
    if B <= 512:
        Bp = _round_up(max(B, 8), 8)
        bt = Bp
    else:
        bt = 512
        Bp = _round_up(B, bt)
    xp = x.astype(packed["compute_dtype"])
    if Bp != B:
        xp = jnp.pad(xp, ((0, Bp - B), (0, 0)))

    wbytes = sum(int(a.size) * a.dtype.itemsize for a in (w1, b1, w2, b2, w3, b3))
    cost = pl.CostEstimate(
        flops=2 * Bp * (in_dim * MHp + MHp * MHp + MHp * OUTp),
        transcendentals=Bp * (2 * MHp + 2 * OUTp),
        bytes_accessed=wbytes + int(xp.size) * xp.dtype.itemsize + Bp * OUTp * 4,
    )

    out = pl.pallas_call(
        functools.partial(_fused_ensemble_kernel, num_models=M),
        out_shape=jax.ShapeDtypeStruct((Bp, OUTp), jnp.float32),
        grid_spec=pltpu.PrefetchScalarGridSpec(
            num_scalar_prefetch=0,
            grid=(Bp // bt,),
            in_specs=[
                pl.BlockSpec((bt, in_dim), lambda b: (b, 0)),    # x (batch-tiled)
                pl.BlockSpec((in_dim, MHp), lambda b: (0, 0)),   # w1 (resident)
                pl.BlockSpec((1, MHp), lambda b: (0, 0)),        # b1
                pl.BlockSpec((MHp, MHp), lambda b: (0, 0)),      # w2
                pl.BlockSpec((1, MHp), lambda b: (0, 0)),        # b2
                pl.BlockSpec((MHp, OUTp), lambda b: (0, 0)),     # w3
                pl.BlockSpec((1, OUTp), lambda b: (0, 0)),       # b3
            ],
            out_specs=pl.BlockSpec((bt, OUTp), lambda b: (b, 0)),
        ),
        compiler_params=pltpu.CompilerParams(
            dimension_semantics=("parallel",)),
        cost_estimate=cost,
    )(xp, w1, b1, w2, b2, w3, b3)

    out = out[:B]
    means = out[:, :M]
    logvars = out[:, M:2 * M]
    return means, logvars


def unpack_to_lists(means, logvars, dimensions, ensemble_size):
    """(B, M) slabs -> PyTorch list-of-lists: means_all[d][k] has shape (B, 1)."""
    means_all, logvars_all = [], []
    for d in range(dimensions):
        md, lvd = [], []
        for k in range(ensemble_size):
            idx = d * ensemble_size + k
            md.append(means[:, idx:idx + 1])
            lvd.append(logvars[:, idx:idx + 1])
        means_all.append(md)
        logvars_all.append(lvd)
    return means_all, logvars_all


def init_params(key, dimensions, ensemble_size, in_dim, hidden):
    """Deterministic synthetic parameters, stacked over M = dimensions * ensemble_size."""
    M = dimensions * ensemble_size
    ks = jax.random.split(key, 6)
    scale1 = 1.0 / jnp.sqrt(in_dim)
    scale2 = 1.0 / jnp.sqrt(hidden)
    return {
        "w1": jax.random.uniform(ks[0], (M, in_dim, hidden), jnp.float32, -scale1, scale1),
        "b1": jax.random.uniform(ks[1], (M, 1, hidden), jnp.float32, -scale1, scale1),
        "w2": jax.random.uniform(ks[2], (M, hidden, hidden), jnp.float32, -scale2, scale2),
        "b2": jax.random.uniform(ks[3], (M, 1, hidden), jnp.float32, -scale2, scale2),
        "w3": jax.random.uniform(ks[4], (M, hidden, 2), jnp.float32, -scale2, scale2),
        "b3": jax.random.uniform(ks[5], (M, 1, 2), jnp.float32, -scale2, scale2),
    }


def reference_forward(x, params):
    """Pure-JAX reference mirroring the PyTorch forward, for verification."""
    def one(w1, b1, w2, b2, w3, b3):
        h1 = jax.nn.silu(x @ w1 + b1)
        h2 = jax.nn.silu(h1 @ w2 + b2)
        pred = h2 @ w3 + b3
        mean_k = pred[:, 0:1]
        lv = pred[:, 1:2]
        c = MAX_LOGVAR - jax.nn.softplus(MAX_LOGVAR - lv)
        c = MIN_LOGVAR + jax.nn.softplus(c - MIN_LOGVAR)
        return mean_k, c
    return jax.vmap(one)(params["w1"], params["b1"], params["w2"],
                         params["b2"], params["w3"], params["b3"])


# TODO(synk): RunningNormalizer, Adam training loop, and set_parents_from_prob_matrix
# are host/training-side logic, not part of the forward pass -> not kernelized.

if __name__ == "__main__":
    # Small, module-consistent shapes.
    state_dim = 4
    action_dim = 2
    hidden_units = 32
    ensemble_size = 3
    batch = 8

    dimensions = state_dim + 1
    in_dim = state_dim + action_dim

    key = jax.random.PRNGKey(0)
    kx, kp = jax.random.split(key)
    x = jax.random.normal(kx, (batch, in_dim), jnp.float32)
    params = init_params(kp, dimensions, ensemble_size, in_dim, hidden_units)

    # Pure-JAX reference -> (B, M) layout for comparison.
    ref_means, ref_logvars = reference_forward(x, params)   # (M, B, 1)
    ref_means = jnp.transpose(ref_means[..., 0])             # (B, M)
    ref_logvars = jnp.transpose(ref_logvars[..., 0])

    # Strict check with f32 matmul operands.
    packed_f32 = pack_params(params, use_bf16=False)
    means32, logvars32 = factorized_ensemble_forward(x, packed_f32)
    means32 = jax.block_until_ready(means32)
    logvars32 = jax.block_until_ready(logvars32)
    assert jnp.allclose(means32, ref_means, atol=5e-4), "f32 mean mismatch"
    assert jnp.allclose(logvars32, ref_logvars, atol=5e-4), "f32 logvar mismatch"

    # Default fast path: bf16 MXU operands, f32 accumulation / elementwise.
    packed = pack_params(params, use_bf16=True)
    means, logvars = factorized_ensemble_forward(x, packed)
    means = jax.block_until_ready(means)
    logvars = jax.block_until_ready(logvars)
    assert jnp.allclose(means, ref_means, atol=5e-2), "bf16 mean mismatch"
    assert jnp.allclose(logvars, ref_logvars, atol=5e-2), "bf16 logvar mismatch"

    # Unpack to the PyTorch list-of-lists structure: means_all[d][k] -> (batch, 1)
    means_all, logvars_all = unpack_to_lists(means, logvars, dimensions, ensemble_size)
    assert len(means_all) == dimensions and len(means_all[0]) == ensemble_size
    assert means_all[0][0].shape == (batch, 1)

    print("KERNEL_OK")
</pallas_src>

<mosaic_0001>
module attributes {stable_mosaic.version = 11 : i64} {
  func.func @_fused_ensemble_kernel(%arg0: i32, %arg1: memref<8x6xf32, #tpu.memory_space<vmem>>, %arg2: memref<6x512xf32, #tpu.memory_space<vmem>>, %arg3: memref<1x512xf32, #tpu.memory_space<vmem>>, %arg4: memref<512x512xf32, #tpu.memory_space<vmem>>, %arg5: memref<1x512xf32, #tpu.memory_space<vmem>>, %arg6: memref<512x128xf32, #tpu.memory_space<vmem>>, %arg7: memref<1x128xf32, #tpu.memory_space<vmem>>, %arg8: memref<8x128xf32, #tpu.memory_space<vmem>>) attributes {dimension_semantics = [#tpu.dimension_semantics<parallel>], iteration_bounds = array<i64: 1>, scalar_prefetch = 0 : i64, scratch_operands = 0 : i64, tpu.core_type = #tpu.core_type<tc>, window_params = [{transform_indices = @transform_0, window_bounds = array<i64: 8, 6>}, {pipeline_mode = #tpu.pipeline_mode<synchronous>, transform_indices = @transform_1, window_bounds = array<i64: 6, 512>}, {pipeline_mode = #tpu.pipeline_mode<synchronous>, transform_indices = @transform_2, window_bounds = array<i64: 1, 512>}, {pipeline_mode = #tpu.pipeline_mode<synchronous>, transform_indices = @transform_3, window_bounds = array<i64: 512, 512>}, {pipeline_mode = #tpu.pipeline_mode<synchronous>, transform_indices = @transform_4, window_bounds = array<i64: 1, 512>}, {pipeline_mode = #tpu.pipeline_mode<synchronous>, transform_indices = @transform_5, window_bounds = array<i64: 512, 128>}, {pipeline_mode = #tpu.pipeline_mode<synchronous>, transform_indices = @transform_6, window_bounds = array<i64: 1, 128>}, {transform_indices = @transform_7, window_bounds = array<i64: 8, 128>}]} {
    %c0 = arith.constant 0 : index
    %c0_0 = arith.constant 0 : index
    %0 = vector.load %arg1[%c0, %c0_0] : memref<8x6xf32, #tpu.memory_space<vmem>>, vector<8x6xf32>
    %c0_1 = arith.constant 0 : index
    %c0_2 = arith.constant 0 : index
    %1 = vector.load %arg2[%c0_1, %c0_2] : memref<6x512xf32, #tpu.memory_space<vmem>>, vector<6x512xf32>
    %cst = arith.constant dense<0.000000e+00> : vector<8x512xf32>
    %2 = tpu.matmul %0, %1, %cst {dimension_numbers = #tpu.dot_dimension_numbers<[1], [0], [0], [1], [0, 0, 1, 1], [], []>} : vector<8x6xf32>, vector<6x512xf32>, vector<8x512xf32> -> vector<8x512xf32>
    %c0_3 = arith.constant 0 : index
    %c0_4 = arith.constant 0 : index
    %3 = vector.load %arg3[%c0_3, %c0_4] : memref<1x512xf32, #tpu.memory_space<vmem>>, vector<1x512xf32>
    %4 = vector.broadcast %3 : vector<1x512xf32> to vector<8x512xf32>
    %5 = arith.addf %2, %4 : vector<8x512xf32>
    %6 = arith.negf %5 : vector<8x512xf32>
    %7 = math.exp %6 : vector<8x512xf32>
    %cst_5 = arith.constant 1.000000e+00 : f32
    %8 = vector.broadcast %cst_5 : f32 to vector<8x512xf32>
    %9 = arith.addf %8, %7 : vector<8x512xf32>
    %10 = arith.divf %8, %9 : vector<8x512xf32>
    %11 = arith.mulf %5, %10 : vector<8x512xf32>
    %c0_6 = arith.constant 0 : index
    %c0_7 = arith.constant 0 : index
    %12 = vector.load %arg4[%c0_6, %c0_7] : memref<512x512xf32, #tpu.memory_space<vmem>>, vector<512x512xf32>
    %cst_8 = arith.constant dense<0.000000e+00> : vector<8x512xf32>
    %13 = tpu.matmul %11, %12, %cst_8 {dimension_numbers = #tpu.dot_dimension_numbers<[1], [0], [0], [1], [0, 0, 1, 1], [], []>} : vector<8x512xf32>, vector<512x512xf32>, vector<8x512xf32> -> vector<8x512xf32>
    %c0_9 = arith.constant 0 : index
    %c0_10 = arith.constant 0 : index
    %14 = vector.load %arg5[%c0_9, %c0_10] : memref<1x512xf32, #tpu.memory_space<vmem>>, vector<1x512xf32>
    %15 = vector.broadcast %14 : vector<1x512xf32> to vector<8x512xf32>
    %16 = arith.addf %13, %15 : vector<8x512xf32>
    %17 = arith.negf %16 : vector<8x512xf32>
    %18 = math.exp %17 : vector<8x512xf32>
    %cst_11 = arith.constant 1.000000e+00 : f32
    %19 = vector.broadcast %cst_11 : f32 to vector<8x512xf32>
    %20 = arith.addf %19, %18 : vector<8x512xf32>
    %21 = arith.divf %19, %20 : vector<8x512xf32>
    %22 = arith.mulf %16, %21 : vector<8x512xf32>
    %c0_12 = arith.constant 0 : index
    %c0_13 = arith.constant 0 : index
    %23 = vector.load %arg6[%c0_12, %c0_13] : memref<512x128xf32, #tpu.memory_space<vmem>>, vector<512x128xf32>
    %cst_14 = arith.constant dense<0.000000e+00> : vector<8x128xf32>
    %24 = tpu.matmul %22, %23, %cst_14 {dimension_numbers = #tpu.dot_dimension_numbers<[1], [0], [0], [1], [0, 0, 1, 1], [], []>} : vector<8x512xf32>, vector<512x128xf32>, vector<8x128xf32> -> vector<8x128xf32>
    %c0_15 = arith.constant 0 : index
    %c0_16 = arith.constant 0 : index
    %25 = vector.load %arg7[%c0_15, %c0_16] : memref<1x128xf32, #tpu.memory_space<vmem>>, vector<1x128xf32>
    %26 = vector.broadcast %25 : vector<1x128xf32> to vector<8x128xf32>
    %27 = arith.addf %24, %26 : vector<8x128xf32>
    %cst_17 = arith.constant 5.000000e+00 : f32
    %28 = vector.broadcast %cst_17 : f32 to vector<8x128xf32>
    %29 = arith.subf %28, %27 : vector<8x128xf32>
    %cst_18 = arith.constant 0.000000e+00 : f32
    %30 = vector.broadcast %cst_18 : f32 to vector<8x128xf32>
    %31 = arith.maximumf %29, %30 : vector<8x128xf32>
    %32 = vector.broadcast %cst_18 : f32 to vector<8x128xf32>
    %33 = arith.subf %29, %32 : vector<8x128xf32>
    %34 = arith.cmpf one, %33, %33 : vector<8x128xf32>
    %35 = vector.broadcast %cst_18 : f32 to vector<8x128xf32>
    %36 = arith.addf %29, %35 : vector<8x128xf32>
    %37 = math.absf %33 : vector<8x128xf32>
    %cst_19 = arith.constant 0.000000e+00 : f32
    %38 = vector.broadcast %cst_19 : f32 to vector<8x128xf32>
    %39 = arith.subf %38, %37 : vector<8x128xf32>
    %40 = math.exp %39 : vector<8x128xf32>
    %41 = math.log1p %40 : vector<8x128xf32>
    %42 = arith.addf %31, %41 : vector<8x128xf32>
    %43 = arith.select %34, %36, %42 : vector<8x128xi1>, vector<8x128xf32>
    %cst_20 = arith.constant 5.000000e+00 : f32
    %44 = vector.broadcast %cst_20 : f32 to vector<8x128xf32>
    %45 = arith.subf %44, %43 : vector<8x128xf32>
    %cst_21 = arith.constant -1.000000e+01 : f32
    %46 = vector.broadcast %cst_21 : f32 to vector<8x128xf32>
    %47 = arith.subf %45, %46 : vector<8x128xf32>
    %cst_22 = arith.constant 0.000000e+00 : f32
    %48 = vector.broadcast %cst_22 : f32 to vector<8x128xf32>
    %49 = arith.maximumf %47, %48 : vector<8x128xf32>
    %50 = vector.broadcast %cst_22 : f32 to vector<8x128xf32>
    %51 = arith.subf %47, %50 : vector<8x128xf32>
    %52 = arith.cmpf one, %51, %51 : vector<8x128xf32>
    %53 = vector.broadcast %cst_22 : f32 to vector<8x128xf32>
    %54 = arith.addf %47, %53 : vector<8x128xf32>
    %55 = math.absf %51 : vector<8x128xf32>
    %cst_23 = arith.constant 0.000000e+00 : f32
    %56 = vector.broadcast %cst_23 : f32 to vector<8x128xf32>
    %57 = arith.subf %56, %55 : vector<8x128xf32>
    %58 = math.exp %57 : vector<8x128xf32>
    %59 = math.log1p %58 : vector<8x128xf32>
    %60 = arith.addf %49, %59 : vector<8x128xf32>
    %61 = arith.select %52, %54, %60 : vector<8x128xi1>, vector<8x128xf32>
    %cst_24 = arith.constant -1.000000e+01 : f32
    %62 = vector.broadcast %cst_24 : f32 to vector<8x128xf32>
    %63 = arith.addf %62, %61 : vector<8x128xf32>
    %64 = tpu.iota {dimensions = array<i32: 1>} : vector<8x128xi32>
    %c15_i32 = arith.constant 15 : i32
    %65 = vector.broadcast %c15_i32 : i32 to vector<8x128xi32>
    %66 = arith.cmpi sge, %64, %65 : vector<8x128xi32>
    %c30_i32 = arith.constant 30 : i32
    %67 = vector.broadcast %c30_i32 : i32 to vector<8x128xi32>
    %68 = arith.cmpi slt, %64, %67 : vector<8x128xi32>
    %69 = arith.andi %66, %68 : vector<8x128xi1>
    %70 = arith.select %69, %63, %27 : vector<8x128xi1>, vector<8x128xf32>
    %c0_25 = arith.constant 0 : index
    %c0_26 = arith.constant 0 : index
    %71 = vector.load %arg8[%c0_25, %c0_26] : memref<8x128xf32, #tpu.memory_space<vmem>>, vector<8x128xf32>
    tpu.vector_store %arg8[%c0_25, %c0_26], %70 {strides = array<i32>} : memref<8x128xf32, #tpu.memory_space<vmem>>, vector<8x128xf32>,
    return
  }
  func.func @transform_0(%arg0: i32) -> (i32, i32) {
    %c0_i32 = arith.constant 0 : i32
    %c0_i32_0 = arith.constant 0 : i32
    return %arg0, %c0_i32 : i32, i32
  }
  func.func @transform_1(%arg0: i32) -> (i32, i32) {
    %c0_i32 = arith.constant 0 : i32
    %c0_i32_0 = arith.constant 0 : i32
    %c0_i32_1 = arith.constant 0 : i32
    return %c0_i32, %c0_i32_0 : i32, i32
  }
  func.func @transform_2(%arg0: i32) -> (i32, i32) {
    %c0_i32 = arith.constant 0 : i32
    %c0_i32_0 = arith.constant 0 : i32
    %c0_i32_1 = arith.constant 0 : i32
    return %c0_i32, %c0_i32_0 : i32, i32
  }
  func.func @transform_3(%arg0: i32) -> (i32, i32) {
    %c0_i32 = arith.constant 0 : i32
    %c0_i32_0 = arith.constant 0 : i32
    %c0_i32_1 = arith.constant 0 : i32
    return %c0_i32, %c0_i32_0 : i32, i32
  }
  func.func @transform_4(%arg0: i32) -> (i32, i32) {
    %c0_i32 = arith.constant 0 : i32
    %c0_i32_0 = arith.constant 0 : i32
    %c0_i32_1 = arith.constant 0 : i32
    return %c0_i32, %c0_i32_0 : i32, i32
  }
  func.func @transform_5(%arg0: i32) -> (i32, i32) {
    %c0_i32 = arith.constant 0 : i32
    %c0_i32_0 = arith.constant 0 : i32
    %c0_i32_1 = arith.constant 0 : i32
    return %c0_i32, %c0_i32_0 : i32, i32
  }
  func.func @transform_6(%arg0: i32) -> (i32, i32) {
    %c0_i32 = arith.constant 0 : i32
    %c0_i32_0 = arith.constant 0 : i32
    %c0_i32_1 = arith.constant 0 : i32
    return %c0_i32, %c0_i32_0 : i32, i32
  }
  func.func @transform_7(%arg0: i32) -> (i32, i32) {
    %c0_i32 = arith.constant 0 : i32
    %c0_i32_0 = arith.constant 0 : i32
    return %arg0, %c0_i32 : i32, i32
  }
}

</mosaic_0001>

<bundles_post_ra>
// kernel: tpu_custom_call.1
= control target key start
LH: loop header
LB: loop body
LE: loop exit
PB: predicated region body
PF: predicated region fallthrough
CT: control target
= control target key end

     0   :  { %12 = vsyncpa [#allocation3], 0  ;;  %s1591_s0 = inlined_call_operand.hbm [shape: f32[8,6], index: 0, kind: input, shape index: {}]   ;;  %s1592_s1 = inlined_call_operand.hbm [shape: f32[6,512], index: 1, kind: input, shape index: {}]   ;;  %s1593_s2 = inlined_call_operand.hbm [shape: f32[1,512], index: 2, kind: input, shape index: {}]   ;;  %s1594_s3 = inlined_call_operand.hbm [shape: f32[512,512], index: 3, kind: input, shape index: {}]   ;;  %s1595_s4 = inlined_call_operand.hbm [shape: f32[1,512], index: 4, kind: input, shape index: {}]   ;;  %s1596_s5 = inlined_call_operand.hbm [shape: f32[512,128], index: 5, kind: input, shape index: {}]   ;;  %s1597_s6 = inlined_call_operand.vmem [shape: f32[1,128], index: 6, kind: input, shape index: {}]   ;;  %s1598_s7 = inlined_call_operand.hbm [shape: f32[8,128], index: 7, kind: output, shape index: {}]  }
   0x1   :  { %13 = vsyncpa [#allocation6], 0 }
   0x2   :  { %14 = vsyncpa [#allocation9], 0 }
   0x3   :  { %15 = vsyncpa [#allocation12], 0  ;;  %s33_s26 = sshll.u32 %s1592_s1, 4  ;;  %s34_s26 = int_to_ptr.hbm [resolvable:$true] %s33_s26 }
   0x4   :  { %16 = vsyncpa [#allocation4], 0  ;;  %s1433_s27 = smov [#allocation5]   ;;  %s54_s8 = sshll.u32 %s1594_s3, 4  ;;  %s55_s8 = int_to_ptr.hbm [resolvable:$true] %s54_s8 }
   0x5   :  { %s35_s28 = sshll.u32 %s1433_s27, 4  ;;  %s1434_s9 = smov [#allocation8]   ;;  %s36_s28 = int_to_ptr.vmem [resolvable:$true] %s35_s28 }
   0x6   :  { %38 = dma.hbm_to_vmem [thread:$0]  %s34_s26, 512, %s36_s28, [#allocation6]  }
   0x7   :  { %s56_s10 = sshll.u32 %s1434_s9, 4  ;;  %s1435_s11 = smov 512   ;;  %s57_s10 = int_to_ptr.vmem [resolvable:$true] %s56_s10 }
   0x8   :  { %s1436_s12 = smov 32   ;;  %s22_s1 = sshll.u32 %s1591_s0, 4  ;;  %s23_s1 = int_to_ptr.hbm [resolvable:$true] %s22_s1 }
   0x9   :  { %62 = dma.hbm_to_vmem [thread:$0]  %s55_s8, 32768, %s57_s10, [#allocation9], %s1435_s11, %s1435_s11, %s1436_s12  }
   0xa   :  { %s1437_s15 = smov [#allocation2]   ;;  %s44_s3 = sshll.u32 %s1593_s2, 4  ;;  %s45_s3 = int_to_ptr.hbm [resolvable:$true] %s44_s3 }
   0xb   :  { %s24_s16 = sshll.u32 %s1437_s15, 4  ;;  %s1438_s19 = smov [#allocation7]   ;;  %s25_s16 = int_to_ptr.vmem [resolvable:$true] %s24_s16 }
   0xc   :  { %27 = dma.hbm_to_vmem [thread:$0]  %s23_s1, 128, %s25_s16, [#allocation3]  }
   0xd   :  { %s46_s20 = sshll.u32 %s1438_s19, 4  ;;  %s68_s23 = sshll.u32 %s1595_s4, 4  ;;  %s47_s20 = int_to_ptr.vmem [resolvable:$true] %s46_s20  ;;  %s69_s23 = int_to_ptr.hbm [resolvable:$true] %s68_s23 }
   0xe   :  { %49 = dma.hbm_to_vmem [thread:$0]  %s45_s3, 64, %s47_s20, [#allocation6]  }
   0xf   :  { %s78_s25 = sshll.u32 %s1596_s5, 4  ;;  %s1439_s26 = smov [#allocation10]   ;;  %s79_s25 = int_to_ptr.hbm [resolvable:$true] %s78_s25 }
  0x10   :  { %s70_s27 = sshll.u32 %s1439_s26, 4  ;;  %s1440_s2 = smov [#allocation11]   ;;  %s71_s27 = int_to_ptr.vmem [resolvable:$true] %s70_s27 }
  0x11   :  { %73 = dma.hbm_to_vmem [thread:$0]  %s69_s23, 64, %s71_s27, [#allocation9]  }
  0x12   :  { %s80_s28 = sshll.u32 %s1440_s2, 4  ;;  %s1441_s29 = smov 128   ;;  %s81_s28 = int_to_ptr.vmem [resolvable:$true] %s80_s28 }
  0x13   :  { %s1442_s30 = smov 8  }
  0x14   :  { %86 = dma.hbm_to_vmem [thread:$0]  %s79_s25, 8192, %s81_s28, [#allocation12], %s1441_s29, %s1441_s29, %s1442_s30  }
  0x15   :  { %1423 = dma.done.wait [#allocation3], 128  }
  0x16   :  { %1424 = vsyncadd [#allocation3], 4294967168 }
  0x17   :  { %1425 = dma.done.wait [#allocation6], 576  }
  0x18   :  { %1426 = vsyncadd [#allocation6], 4294966720 }
  0x19   :  { %1427 = dma.done.wait [#allocation9], 32832  }
  0x1a   :  { %1428 = vsyncadd [#allocation9], 4294934464 }
  0x1b   :  { %1429 = dma.done.wait [#allocation12], 8192  }
  0x1c   :  { %1430 = vsyncadd [#allocation12], 4294959104  ;;  %vm132_vm0 = vcmask 1045504   ;;  %vm128_vm1 = vcmask 48128   ;;  %v114_v0 = vld [vmem:[#allocation5] sm:$0x3f] }
  0x1d   :  { %v115_v1 = vld [vmem:[#allocation5 + $0x8] sm:$0x3f]  ;;  %v116_v2 = vld [vmem:[#allocation5 + $0x10] sm:$0x3f]  ;;  %1186 = vmatpush.msk.msra.mxu0 %vm132_vm0, %v114_v0  ;;  %v117_v3 = vld [vmem:[#allocation5 + $0x18] sm:$0x3f] }
  0x1e   :  { %1188 = vmatpush.msk.msra.mxu1 %vm132_vm0, %v115_v1  ;;  %v113_v4 = vld [vmem:[#allocation2] sm:$0xff]  ;;  %1190 = vmatpush.msk.msra.mxu2 %vm132_vm0, %v116_v2  ;;  %v365_v5 = vld [vmem:[#allocation8 + $0x1e0] sm:$0xff]  ;;  %v366_v63 = vld [vmem:[#allocation8 + $0x1e8] sm:$0xff]  ;;  %s1173_s11 = sshll.u32 %s1598_s7, 4  ;;  %s1174_s11 = int_to_ptr.hbm [resolvable:$true] %s1173_s11 }
  0x1f   :  { %1192 = vmatpush.msk.msra.mxu3 %vm132_vm0, %v117_v3  ;;  %v429_v6 = vld [vmem:[#allocation8 + $0x3e0] sm:$0xff]  ;;  %1187 = vmatmul.msk.f32.vlgmr.msra.gmra.mxu0 %vm128_vm1, %v113_v4  ;;  %v430_v0 = vld [vmem:[#allocation8 + $0x3e8] sm:$0xff] }
  0x20   :  { %1189 = vmatmul.msk.f32.vlgmr.msra.gmra.mxu1 %vm128_vm1, %v113_v4  ;;  %v361_v7 = vld [vmem:[#allocation8 + $0x1c0] sm:$0xff]  ;;  %1191 = vmatmul.msk.f32.vlgmr.msra.gmra.mxu2 %vm128_vm1, %v113_v4  ;;  %v362_v3 = vld [vmem:[#allocation8 + $0x1c8] sm:$0xff] }
  0x21   :  { %1193 = vmatmul.msk.f32.vlgmr.msra.gmra.mxu3 %vm128_vm1, %v113_v4  ;;  %v425_v8 = vld [vmem:[#allocation8 + $0x3c0] sm:$0xff]  ;;  %571 = vmatpush.msrb.mxu0 %v365_v5  ;;  %v426_v4 = vld [vmem:[#allocation8 + $0x3c8] sm:$0xff] }
  0x22   :  { %v493_v9 = vld [vmem:[#allocation8 + $0x5e0] sm:$0xff]  ;;  %591 = vmatpush.msrb.mxu1 %v429_v6 }
  0x23   :  { %v557_v10 = vld [vmem:[#allocation8 + $0x7e0] sm:$0xff]  ;;  %611 = vmatpush.msrb.mxu2 %v493_v9  ;;  %572 = vmatpush.msrb.mxu0 %v361_v7  ;;  %v358_v7 = vld [vmem:[#allocation8 + $0x1a8] sm:$0xff] }
  0x24   :  { %v489_v11 = vld [vmem:[#allocation8 + $0x5c0] sm:$0xff]  ;;  %631 = vmatpush.msrb.mxu3 %v557_v10  ;;  %592 = vmatpush.msrb.mxu1 %v425_v8  ;;  %v422_v8 = vld [vmem:[#allocation8 + $0x3a8] sm:$0xff] }
  0x25   :  { %v357_v12 = vld [vmem:[#allocation8 + $0x1a0] sm:$0xff]  ;;  %612 = vmatpush.msrb.mxu2 %v489_v11  ;;  %v354_v11 = vld [vmem:[#allocation8 + $0x188] sm:$0xff] }
  0x26   :  { %v421_v13 = vld [vmem:[#allocation8 + $0x3a0] sm:$0xff]  ;;  %573 = vmatpush.msrb.mxu0 %v357_v12  ;;  %v418_v12 = vld [vmem:[#allocation8 + $0x388] sm:$0xff] }
  0x27   :  { %v553_v14 = vld [vmem:[#allocation8 + $0x7c0] sm:$0xff]  ;;  %593 = vmatpush.msrb.mxu1 %v421_v13  ;;  %v494_v13 = vld [vmem:[#allocation8 + $0x5e8] sm:$0xff] }
  0x28   :  { %v485_v15 = vld [vmem:[#allocation8 + $0x5a0] sm:$0xff]  ;;  %632 = vmatpush.msrb.mxu3 %v553_v14  ;;  %v558_v14 = vld [vmem:[#allocation8 + $0x7e8] sm:$0xff] }
  0x29   :  { %v549_v16 = vld [vmem:[#allocation8 + $0x7a0] sm:$0xff]  ;;  %613 = vmatpush.msrb.mxu2 %v485_v15  ;;  %v350_v15 = vld [vmem:[#allocation8 + $0x168] sm:$0xff] }
  0x2a   :  { %v353_v17 = vld [vmem:[#allocation8 + $0x180] sm:$0xff]  ;;  %633 = vmatpush.msrb.mxu3 %v549_v16  ;;  %v414_v16 = vld [vmem:[#allocation8 + $0x368] sm:$0xff] }
  0x2b   :  { %v417_v18 = vld [vmem:[#allocation8 + $0x380] sm:$0xff]  ;;  %574 = vmatpush.msrb.mxu0 %v353_v17  ;;  %v490_v17 = vld [vmem:[#allocation8 + $0x5c8] sm:$0xff] }
  0x2c   :  { %v481_v19 = vld [vmem:[#allocation8 + $0x580] sm:$0xff]  ;;  %594 = vmatpush.msrb.mxu1 %v417_v18  ;;  %v554_v18 = vld [vmem:[#allocation8 + $0x7c8] sm:$0xff] }
  0x2d   :  { %v545_v20 = vld [vmem:[#allocation8 + $0x780] sm:$0xff]  ;;  %614 = vmatpush.msrb.mxu2 %v481_v19  ;;  %v346_v19 = vld [vmem:[#allocation8 + $0x148] sm:$0xff] }
  0x2e   :  { %v349_v21 = vld [vmem:[#allocation8 + $0x160] sm:$0xff]  ;;  %634 = vmatpush.msrb.mxu3 %v545_v20  ;;  %v410_v20 = vld [vmem:[#allocation8 + $0x348] sm:$0xff] }
  0x2f   :  { %v413_v22 = vld [vmem:[#allocation8 + $0x360] sm:$0xff]  ;;  %575 = vmatpush.msrb.mxu0 %v349_v21  ;;  %v486_v21 = vld [vmem:[#allocation8 + $0x5a8] sm:$0xff] }
  0x30   :  { %v477_v23 = vld [vmem:[#allocation8 + $0x560] sm:$0xff]  ;;  %595 = vmatpush.msrb.mxu1 %v413_v22  ;;  %v550_v22 = vld [vmem:[#allocation8 + $0x7a8] sm:$0xff] }
  0x31   :  { %v541_v24 = vld [vmem:[#allocation8 + $0x760] sm:$0xff]  ;;  %615 = vmatpush.msrb.mxu2 %v477_v23  ;;  %v342_v23 = vld [vmem:[#allocation8 + $0x128] sm:$0xff] }
  0x32   :  { %v345_v25 = vld [vmem:[#allocation8 + $0x140] sm:$0xff]  ;;  %635 = vmatpush.msrb.mxu3 %v541_v24  ;;  %v406_v24 = vld [vmem:[#allocation8 + $0x328] sm:$0xff] }
  0x33   :  { %v409_v26 = vld [vmem:[#allocation8 + $0x340] sm:$0xff]  ;;  %576 = vmatpush.msrb.mxu0 %v345_v25  ;;  %v482_v25 = vld [vmem:[#allocation8 + $0x588] sm:$0xff] }
  0x34   :  { %v473_v27 = vld [vmem:[#allocation8 + $0x540] sm:$0xff]  ;;  %596 = vmatpush.msrb.mxu1 %v409_v26  ;;  %v546_v26 = vld [vmem:[#allocation8 + $0x788] sm:$0xff] }
  0x35   :  { %v537_v28 = vld [vmem:[#allocation8 + $0x740] sm:$0xff]  ;;  %616 = vmatpush.msrb.mxu2 %v473_v27  ;;  %v338_v27 = vld [vmem:[#allocation8 + $0x108] sm:$0xff] }
  0x36   :  { %v341_v29 = vld [vmem:[#allocation8 + $0x120] sm:$0xff]  ;;  %636 = vmatpush.msrb.mxu3 %v537_v28  ;;  %v402_v28 = vld [vmem:[#allocation8 + $0x308] sm:$0xff] }
  0x37   :  { %v405_v30 = vld [vmem:[#allocation8 + $0x320] sm:$0xff]  ;;  %577 = vmatpush.msrb.mxu0 %v341_v29  ;;  %v478_v29 = vld [vmem:[#allocation8 + $0x568] sm:$0xff] }
  0x38   :  { %v469_v31 = vld [vmem:[#allocation8 + $0x520] sm:$0xff]  ;;  %597 = vmatpush.msrb.mxu1 %v405_v30  ;;  %v542_v30 = vld [vmem:[#allocation8 + $0x768] sm:$0xff] }
  0x39   :  { %v533_v32 = vld [vmem:[#allocation8 + $0x720] sm:$0xff]  ;;  %617 = vmatpush.msrb.mxu2 %v469_v31  ;;  %v334_v31 = vld [vmem:[#allocation8 + $0xe8] sm:$0xff] }
  0x3a   :  { %v337_v33 = vld [vmem:[#allocation8 + $0x100] sm:$0xff]  ;;  %637 = vmatpush.msrb.mxu3 %v533_v32  ;;  %v398_v32 = vld [vmem:[#allocation8 + $0x2e8] sm:$0xff] }
  0x3b   :  { %v401_v34 = vld [vmem:[#allocation8 + $0x300] sm:$0xff]  ;;  %578 = vmatpush.msrb.mxu0 %v337_v33  ;;  %v474_v33 = vld [vmem:[#allocation8 + $0x548] sm:$0xff] }
  0x3c   :  { %v465_v35 = vld [vmem:[#allocation8 + $0x500] sm:$0xff]  ;;  %598 = vmatpush.msrb.mxu1 %v401_v34  ;;  %v538_v34 = vld [vmem:[#allocation8 + $0x748] sm:$0xff] }
  0x3d   :  { %v529_v36 = vld [vmem:[#allocation8 + $0x700] sm:$0xff]  ;;  %618 = vmatpush.msrb.mxu2 %v465_v35  ;;  %v330_v35 = vld [vmem:[#allocation8 + $0xc8] sm:$0xff] }
  0x3e   :  { %v333_v37 = vld [vmem:[#allocation8 + $0xe0] sm:$0xff]  ;;  %638 = vmatpush.msrb.mxu3 %v529_v36  ;;  %v394_v36 = vld [vmem:[#allocation8 + $0x2c8] sm:$0xff] }
  0x3f   :  { %v397_v38 = vld [vmem:[#allocation8 + $0x2e0] sm:$0xff]  ;;  %579 = vmatpush.msrb.mxu0 %v333_v37  ;;  %v470_v37 = vld [vmem:[#allocation8 + $0x528] sm:$0xff] }
  0x40   :  { %v461_v39 = vld [vmem:[#allocation8 + $0x4e0] sm:$0xff]  ;;  %599 = vmatpush.msrb.mxu1 %v397_v38  ;;  %v534_v38 = vld [vmem:[#allocation8 + $0x728] sm:$0xff] }
  0x41   :  { %v525_v40 = vld [vmem:[#allocation8 + $0x6e0] sm:$0xff]  ;;  %619 = vmatpush.msrb.mxu2 %v461_v39  ;;  %v326_v39 = vld [vmem:[#allocation8 + $0xa8] sm:$0xff] }
  0x42   :  { %v329_v41 = vld [vmem:[#allocation8 + $0xc0] sm:$0xff]  ;;  %639 = vmatpush.msrb.mxu3 %v525_v40  ;;  %v390_v40 = vld [vmem:[#allocation8 + $0x2a8] sm:$0xff] }
  0x43   :  { %v393_v42 = vld [vmem:[#allocation8 + $0x2c0] sm:$0xff]  ;;  %580 = vmatpush.msrb.mxu0 %v329_v41  ;;  %v466_v41 = vld [vmem:[#allocation8 + $0x508] sm:$0xff] }
  0x44   :  { %v457_v43 = vld [vmem:[#allocation8 + $0x4c0] sm:$0xff]  ;;  %600 = vmatpush.msrb.mxu1 %v393_v42  ;;  %v1506_v42 = vld [vmem:[#allocation7] sm:$0xf] }
  0x45   :  { %v521_v44 = vld [vmem:[#allocation8 + $0x6c0] sm:$0xff]  ;;  %620 = vmatpush.msrb.mxu2 %v457_v43  ;;  %v530_v43 = vld [vmem:[#allocation8 + $0x708] sm:$0xff] }
  0x46   :  { %v325_v45 = vld [vmem:[#allocation8 + $0xa0] sm:$0xff]  ;;  %640 = vmatpush.msrb.mxu3 %v521_v44  ;;  %v322_v44 = vld [vmem:[#allocation8 + $0x88] sm:$0xff] }
  0x47   :  { %v389_v46 = vld [vmem:[#allocation8 + $0x2a0] sm:$0xff]  ;;  %581 = vmatpush.msrb.mxu0 %v325_v45  ;;  %v386_v45 = vld [vmem:[#allocation8 + $0x288] sm:$0xff] }
  0x48   :  { %v453_v47 = vld [vmem:[#allocation8 + $0x4a0] sm:$0xff]  ;;  %601 = vmatpush.msrb.mxu1 %v389_v46  ;;  %v462_v46 = vld [vmem:[#allocation8 + $0x4e8] sm:$0xff] }
  0x49   :  { %v517_v48 = vld [vmem:[#allocation8 + $0x6a0] sm:$0xff]  ;;  %621 = vmatpush.msrb.mxu2 %v453_v47  ;;  %v526_v47 = vld [vmem:[#allocation8 + $0x6e8] sm:$0xff] }
  0x4a   :  { %v321_v49 = vld [vmem:[#allocation8 + $0x80] sm:$0xff]  ;;  %641 = vmatpush.msrb.mxu3 %v517_v48  ;;  %v120_v48 = vperm.slane %v1506_v42, 0 }
  0x4b   :  { %v385_v50 = vld [vmem:[#allocation8 + $0x280] sm:$0xff]  ;;  %582 = vmatpush.msrb.mxu0 %v321_v49  ;;  %v121_v49 = vperm.slane %v1506_v42, 1 }
  0x4c   :  { %v449_v51 = vld [vmem:[#allocation8 + $0x480] sm:$0xff]  ;;  %602 = vmatpush.msrb.mxu1 %v385_v50  ;;  %v318_v50 = vld [vmem:[#allocation8 + $0x68] sm:$0xff] }
  0x4d   :  { %v513_v52 = vld [vmem:[#allocation8 + $0x680] sm:$0xff]  ;;  %622 = vmatpush.msrb.mxu2 %v449_v51  ;;  %v382_v51 = vld [vmem:[#allocation8 + $0x268] sm:$0xff] }
  0x4e   :  { %v317_v53 = vld [vmem:[#allocation8 + $0x60] sm:$0xff]  ;;  %642 = vmatpush.msrb.mxu3 %v513_v52  ;;  %v458_v52 = vld [vmem:[#allocation8 + $0x4c8] sm:$0xff] }
  0x4f   :  { %v381_v54 = vld [vmem:[#allocation8 + $0x260] sm:$0xff]  ;;  %583 = vmatpush.msrb.mxu0 %v317_v53  ;;  %v522_v53 = vld [vmem:[#allocation8 + $0x6c8] sm:$0xff] }
  0x50   :  { %v313_v55 = vld [vmem:[#allocation8 + $0x40] sm:$0xff]  ;;  %603 = vmatpush.msrb.mxu1 %v381_v54  ;;  %v314_v54 = vld [vmem:[#allocation8 + $0x48] sm:$0xff] }
  0x51   :  { %v377_v56 = vld [vmem:[#allocation8 + $0x240] sm:$0xff]  ;;  %584 = vmatpush.msrb.mxu0 %v313_v55  ;;  %v378_v55 = vld [vmem:[#allocation8 + $0x248] sm:$0xff] }
  0x52   :  { %v309_v57 = vld [vmem:[#allocation8 + $0x20] sm:$0xff]  ;;  %604 = vmatpush.msrb.mxu1 %v377_v56  ;;  %v454_v56 = vld [vmem:[#allocation8 + $0x4a8] sm:$0xff] }
  0x53   :  { %v373_v58 = vld [vmem:[#allocation8 + $0x220] sm:$0xff]  ;;  %585 = vmatpush.msrb.mxu0 %v309_v57 }
  0x54   :  { %605 = vmatpush.msrb.mxu1 %v373_v58  ;;  %v305_v59 = vld [vmem:[#allocation8] sm:$0xff] }
  0x55   :  { %v369_v60 = vld [vmem:[#allocation8 + $0x200] sm:$0xff]  ;;  %586 = vmatpush.msrb.mxu0 %v305_v59  ;;  %v518_v59 = vld [vmem:[#allocation8 + $0x6a8] sm:$0xff] }
  0x56   :  { %v445_v61 = vld [vmem:[#allocation8 + $0x460] sm:$0xff]  ;;  %606 = vmatpush.msrb.mxu1 %v369_v60 }
  0x57   :  { %v509_v62 = vld [vmem:[#allocation8 + $0x660] sm:$0xff]  ;;  %623 = vmatpush.msrb.mxu2 %v445_v61  ;;  %651 = vmatpush.msra.mxu0 %v366_v63  ;;  %v374_v63 = vld [vmem:[#allocation8 + $0x228] sm:$0xff] }
  0x58   :  { %643 = vmatpush.msrb.mxu3 %v509_v62  ;;  %v441_v1 = vld [vmem:[#allocation8 + $0x440] sm:$0xff]  ;;  %671 = vmatpush.msra.mxu1 %v430_v0  ;;  %v310_v62 = vld [vmem:[#allocation8 + $0x28] sm:$0xff] }
  0x59   :  { %v505_v2 = vld [vmem:[#allocation8 + $0x640] sm:$0xff]  ;;  %624 = vmatpush.msrb.mxu2 %v441_v1  ;;  %652 = vmatpush.msra.mxu0 %v362_v3  ;;  %v450_v0 = vld [vmem:[#allocation8 + $0x488] sm:$0xff] }
  0x5a   :  { %644 = vmatpush.msrb.mxu3 %v505_v2  ;;  %v437_v5 = vld [vmem:[#allocation8 + $0x420] sm:$0xff]  ;;  %672 = vmatpush.msra.mxu1 %v426_v4  ;;  %v514_v1 = vld [vmem:[#allocation8 + $0x688] sm:$0xff] }
  0x5b   :  { %v501_v6 = vld [vmem:[#allocation8 + $0x620] sm:$0xff]  ;;  %625 = vmatpush.msrb.mxu2 %v437_v5  ;;  %653 = vmatpush.msra.mxu0 %v358_v7  ;;  %v306_v4 = vld [vmem:[#allocation8 + $0x8] sm:$0xff]  ;;  %v123_v7 = vperm.slane %v1506_v42, 3 }
  0x5c   :  { %645 = vmatpush.msrb.mxu3 %v501_v6  ;;  %673 = vmatpush.msra.mxu1 %v422_v8  ;;  %v433_v9 = vld [vmem:[#allocation8 + $0x400] sm:$0xff]  ;;  %v370_v5 = vld [vmem:[#allocation8 + $0x208] sm:$0xff]  ;;  %v122_v6 = vperm.slane %v1506_v42, 2 }
  0x5d   :  { %v497_v10 = vld [vmem:[#allocation8 + $0x600] sm:$0xff]  ;;  %626 = vmatpush.msrb.mxu2 %v433_v9  ;;  %654 = vmatpush.msra.mxu0 %v354_v11  ;;  %v446_v8 = vld [vmem:[#allocation8 + $0x468] sm:$0xff] }
  0x5e   :  { %646 = vmatpush.msrb.mxu3 %v497_v10  ;;  %674 = vmatpush.msra.mxu1 %v418_v12  ;;  %v510_v9 = vld [vmem:[#allocation8 + $0x668] sm:$0xff] }
  0x5f   :  { %691 = vmatpush.msra.mxu2 %v494_v13  ;;  %655 = vmatpush.msra.mxu0 %v350_v15  ;;  %v442_v10 = vld [vmem:[#allocation8 + $0x448] sm:$0xff] }
  0x60   :  { %711 = vmatpush.msra.mxu3 %v558_v14  ;;  %675 = vmatpush.msra.mxu1 %v414_v16  ;;  %v506_v11 = vld [vmem:[#allocation8 + $0x648] sm:$0xff] }
  0x61   :  { %692 = vmatpush.msra.mxu2 %v490_v17  ;;  %656 = vmatpush.msra.mxu0 %v346_v19  ;;  %v438_v14 = vld [vmem:[#allocation8 + $0x428] sm:$0xff] }
  0x62   :  { %712 = vmatpush.msra.mxu3 %v554_v18  ;;  %676 = vmatpush.msra.mxu1 %v410_v20  ;;  %v502_v15 = vld [vmem:[#allocation8 + $0x628] sm:$0xff] }
  0x63   :  { %693 = vmatpush.msra.mxu2 %v486_v21  ;;  %657 = vmatpush.msra.mxu0 %v342_v23  ;;  %v434_v18 = vld [vmem:[#allocation8 + $0x408] sm:$0xff] }
  0x64   :  { %713 = vmatpush.msra.mxu3 %v550_v22  ;;  %677 = vmatpush.msra.mxu1 %v406_v24  ;;  %v498_v19 = vld [vmem:[#allocation8 + $0x608] sm:$0xff] }
  0x65   :  { %694 = vmatpush.msra.mxu2 %v482_v25  ;;  %658 = vmatpush.msra.mxu0 %v338_v27 }
  0x66   :  { %714 = vmatpush.msra.mxu3 %v546_v26  ;;  %678 = vmatpush.msra.mxu1 %v402_v28 }
  0x67   :  { %695 = vmatpush.msra.mxu2 %v478_v29  ;;  %659 = vmatpush.msra.mxu0 %v334_v31 }
  0x68   :  { %715 = vmatpush.msra.mxu3 %v542_v30  ;;  %679 = vmatpush.msra.mxu1 %v398_v32 }
  0x69   :  { %696 = vmatpush.msra.mxu2 %v474_v33  ;;  %660 = vmatpush.msra.mxu0 %v330_v35 }
  0x6a   :  { %716 = vmatpush.msra.mxu3 %v538_v34  ;;  %680 = vmatpush.msra.mxu1 %v394_v36 }
  0x6b   :  { %697 = vmatpush.msra.mxu2 %v470_v37  ;;  %661 = vmatpush.msra.mxu0 %v326_v39 }
  0x6c   :  { %717 = vmatpush.msra.mxu3 %v534_v38  ;;  %681 = vmatpush.msra.mxu1 %v390_v40 }
  0x6d   :  { %698 = vmatpush.msra.mxu2 %v466_v41  ;;  %662 = vmatpush.msra.mxu0 %v322_v44 }
  0x6e   :  { %718 = vmatpush.msra.mxu3 %v530_v43  ;;  %682 = vmatpush.msra.mxu1 %v386_v45 }
  0x6f   :  { %699 = vmatpush.msra.mxu2 %v462_v46  ;;  %663 = vmatpush.msra.mxu0 %v318_v50 }
  0x70   :  { %719 = vmatpush.msra.mxu3 %v526_v47  ;;  %683 = vmatpush.msra.mxu1 %v382_v51 }
  0x71   :  { %700 = vmatpush.msra.mxu2 %v458_v52  ;;  %664 = vmatpush.msra.mxu0 %v314_v54 }
  0x72   :  { %720 = vmatpush.msra.mxu3 %v522_v53  ;;  %684 = vmatpush.msra.mxu1 %v378_v55 }
  0x73   :  { %701 = vmatpush.msra.mxu2 %v454_v56  ;;  %665 = vmatpush.msra.mxu0 %v310_v62 }
  0x74   :  { %721 = vmatpush.msra.mxu3 %v518_v59  ;;  %685 = vmatpush.msra.mxu1 %v374_v63 }
  0x75   :  { %702 = vmatpush.msra.mxu2 %v450_v0  ;;  %666 = vmatpush.msra.mxu0 %v306_v4  ;;  %v431_v0 = vld [vmem:[#allocation8 + $0x3f0] sm:$0xff] }
  0x76   :  { %722 = vmatpush.msra.mxu3 %v514_v1  ;;  %686 = vmatpush.msra.mxu1 %v370_v5 }
  0x77   :  { %703 = vmatpush.msra.mxu2 %v446_v8 }
  0x78   :  { %723 = vmatpush.msra.mxu3 %v510_v9  ;;  %v423_v9 = vld [vmem:[#allocation8 + $0x3b0] sm:$0xff] }
  0x79   :  { %704 = vmatpush.msra.mxu2 %v442_v10 }
  0x7a   :  { %724 = vmatpush.msra.mxu3 %v506_v11 }
  0x7b   :  { %705 = vmatpush.msra.mxu2 %v438_v14 }
  0x7c   :  { %725 = vmatpush.msra.mxu3 %v502_v15  ;;  %v419_v15 = vld [vmem:[#allocation8 + $0x390] sm:$0xff] }
  0x7d   :  { %706 = vmatpush.msra.mxu2 %v434_v18  ;;  %v495_v18 = vld [vmem:[#allocation8 + $0x5f0] sm:$0xff] }
  0x7e   :  { %726 = vmatpush.msra.mxu3 %v498_v19 }
  0x9c   :  { %v162_v57 = vpop.f32.mrf.mxu0 }
  0x9d   :  { %v182_v58 = vpop.f32.mrf.mxu1  ;;  %v1510_v60 = vadd.f32 %v162_v57, %v120_v48 }
  0x9e   :  { %v1512_v61 = vadd.f32 %v182_v58, %v121_v49  ;;  %v367_v58 = vld [vmem:[#allocation8 + $0x1f0] sm:$0xff] }
  0x9f   :  { %v1194_v2 = vmul.f32 -1.442695, %v1510_v60 }
  0xa0   :  { %v1195_v3 = vmul.f32 -1.442695, %v1512_v61 }
  0xa1   :  { %1215 = vpow2.f32 %v1194_v2 }
  0xa2   :  { %1217 = vpow2.f32 %v1195_v3 }
  0xa3   :  { %v202_v12 = vpop.f32.mrf.mxu2 }
  0xa4   :  { %v222_v13 = vpop.f32.mrf.mxu3  ;;  %v1518_v16 = vadd.f32 %v202_v12, %v122_v6  ;;  %v359_v6 = vld [vmem:[#allocation8 + $0x1b0] sm:$0xff] }
  0xa5   :  { %v1520_v17 = vadd.f32 %v222_v13, %v123_v7  ;;  %v355_v12 = vld [vmem:[#allocation8 + $0x190] sm:$0xff] }
  0xa6   :  { %v1196_v20 = vmul.f32 -1.442695, %v1518_v16 }
  0xa7   :  { %v1197_v21 = vmul.f32 -1.442695, %v1520_v17  ;;  %v1216_v22 = vpop.eup %1215 }
  0xa8   :  { %v1218_v23 = vpop.eup %1217  ;;  %v237_v24 = vadd.f32 1.0, %v1216_v22  ;;  %1219 = vpow2.f32 %v1196_v20  ;;  %v351_v22 = vld [vmem:[#allocation8 + $0x170] sm:$0xff] }
  0xa9   :  { %v238_v25 = vadd.f32 1.0, %v1218_v23  ;;  %1221 = vpow2.f32 %v1197_v21  ;;  %v559_v21 = vld [vmem:[#allocation8 + $0x7f0] sm:$0xff] }
  0xaa   :  { %1223 = vrcp.f32 %v237_v24  ;;  %vm246_vm2 = vweird.f32 %v237_v24  ;;  %v250_v35 = vand.u32 2147483647, %v237_v24  ;;  %v252_v36 = vand.u32 2147483648, %v237_v24  ;;  %v415_v23 = vld [vmem:[#allocation8 + $0x370] sm:$0xff] }
  0xab   :  { %1225 = vrcp.f32 %v238_v25  ;;  %v265_v39 = vand.u32 2147483647, %v238_v25  ;;  %v267_v40 = vand.u32 2147483648, %v238_v25  ;;  %vm261_vm4 = vweird.f32 %v238_v25 }
  0xac   :  { %v253_v44 = vor.u32 1.1754944e-38, %v252_v36  ;;  %vm251_vm7 = vcmp.eq.f32.partialorder %v250_v35, 8.507059e+37  ;;  %v543_v35 = vld [vmem:[#allocation8 + $0x770] sm:$0xff] }
  0xad   :  { %vm266_vm9 = vcmp.eq.f32.partialorder %v265_v39, 8.507059e+37  ;;  %v268_v49 = vor.u32 1.1754944e-38, %v267_v40  ;;  %v335_v36 = vld [vmem:[#allocation8 + $0xf0] sm:$0xff] }
  0xae   :  { %v1220_v26 = vpop.eup %1219  ;;  %v539_v39 = vld [vmem:[#allocation8 + $0x750] sm:$0xff] }
  0xaf   :  { %v1222_v27 = vpop.eup %1221  ;;  %v1524_v28 = vadd.f32 1.0, %v1220_v26  ;;  %v487_v26 = vld [vmem:[#allocation8 + $0x5b0] sm:$0xff] }
  0xb0   :  { %v1224_v29 = vpop.eup %1223  ;;  %v1526_v30 = vadd.f32 1.0, %v1222_v27  ;;  %v551_v27 = vld [vmem:[#allocation8 + $0x7b0] sm:$0xff] }
  0xb1   :  { %v1226_v31 = vpop.eup %1225  ;;  %v242_v32 = vmul.f32 %v1224_v29, %v237_v24  ;;  %1227 = vrcp.f32 %v1524_v28  ;;  %vm247_vm3 = vweird.f32 %v1224_v29  ;;  %v280_v56 = vand.u32 2147483647, %v1524_v28  ;;  %v555_v24 = vld [vmem:[#allocation8 + $0x7d0] sm:$0xff] }
  0xb2   :  { %v257_v33 = vmul.f32 %v1226_v31, %v238_v25  ;;  %1229 = vrcp.f32 %v1526_v30  ;;  %vm262_vm5 = vweird.f32 %v1226_v31  ;;  %vm248_vm6 = vmor %vm246_vm2, %vm247_vm3  ;;  %v282_v57 = vand.u32 2147483648, %v1524_v28  ;;  %v347_v25 = vld [vmem:[#allocation8 + $0x150] sm:$0xff] }
  0xb3   :  { %v243_v34 = vsub.f32 1.0, %v242_v32  ;;  %vm263_vm8 = vmor %vm261_vm4, %vm262_vm5  ;;  %vm276_vm11 = vweird.f32 %v1524_v28  ;;  %v297_v1 = vand.u32 2147483648, %v1526_v30  ;;  %v295_v4 = vand.u32 2147483647, %v1526_v30  ;;  %v339_v32 = vld [vmem:[#allocation8 + $0x110] sm:$0xff] }
  0xb4   :  { %v258_v37 = vsub.f32 1.0, %v257_v33  ;;  %v283_v5 = vor.u32 1.1754944e-38, %v282_v57  ;;  %vm281_vm14 = vcmp.eq.f32.partialorder %v280_v56, 8.507059e+37  ;;  %vm291_vm15 = vweird.f32 %v1526_v30  ;;  %v403_v33 = vld [vmem:[#allocation8 + $0x310] sm:$0xff] }
  0xb5   :  { %v244_v38 = vmul.f32 %v1224_v29, %v243_v34  ;;  %v298_v11 = vor.u32 1.1754944e-38, %v297_v1  ;;  %vm296_vm1 = vcmp.eq.f32.partialorder %v295_v4, 8.507059e+37  ;;  %v479_v34 = vld [vmem:[#allocation8 + $0x570] sm:$0xff] }
  0xb6   :  { %v259_v41 = vmul.f32 %v1226_v31, %v258_v37  ;;  %v399_v37 = vld [vmem:[#allocation8 + $0x2f0] sm:$0xff] }
  0xb7   :  { %v1228_v42 = vpop.eup %1227  ;;  %v245_v43 = vadd.f32 %v1224_v29, %v244_v38  ;;  %v475_v38 = vld [vmem:[#allocation8 + $0x550] sm:$0xff] }
  0xb8   :  { %v260_v45 = vadd.f32 %v1226_v31, %v259_v41  ;;  %v272_v46 = vmul.f32 %v1228_v42, %v1524_v28  ;;  %v1230_v47 = vpop.eup %1229  ;;  %vm277_vm10 = vweird.f32 %v1228_v42  ;;  %v343_v28 = vld [vmem:[#allocation8 + $0x130] sm:$0xff] }
  0xb9   :  { %v249_v48 = vsel %vm248_vm6, %v1224_v29, %v245_v43  ;;  %v287_v53 = vmul.f32 %v1230_v47, %v1526_v30  ;;  %vm292_vm12 = vweird.f32 %v1230_v47  ;;  %vm278_vm13 = vmor %vm276_vm11, %vm277_vm10  ;;  %v407_v29 = vld [vmem:[#allocation8 + $0x330] sm:$0xff] }
  0xba   :  { %v254_v50 = vsel %vm251_vm7, %v253_v44, %v249_v48  ;;  %v264_v51 = vsel %vm263_vm8, %v1226_v31, %v260_v45  ;;  %v273_v52 = vsub.f32 1.0, %v272_v46  ;;  %vm293_vm0 = vmor %vm291_vm15, %vm292_vm12  ;;  %v483_v30 = vld [vmem:[#allocation8 + $0x590] sm:$0xff] }
  0xbb   :  { %v1533_v54 = vmul.f32 %v254_v50, %v1510_v60  ;;  %v269_v55 = vsel %vm266_vm9, %v268_v49, %v264_v51  ;;  %v288_v63 = vsub.f32 1.0, %v287_v53  ;;  %v363_v60 = vld [vmem:[#allocation8 + $0x1d0] sm:$0xff] }
  0xbc   :  { %v1538_v59 = vmul.f32 %v269_v55, %v1512_v61  ;;  %v274_v62 = vmul.f32 %v1228_v42, %v273_v52  ;;  %v427_v61 = vld [vmem:[#allocation8 + $0x3d0] sm:$0xff] }
  0xbd   :  { %587 = vmatmul.f32.vlgmr.msrb.gmra.mxu0 %v1533_v54  ;;  %v289_v3 = vmul.f32 %v1230_v47, %v288_v63  ;;  %v547_v31 = vld [vmem:[#allocation8 + $0x790] sm:$0xff] }
  0xbe   :  { %v275_v2 = vadd.f32 %v1228_v42, %v274_v62  ;;  %607 = vmatmul.f32.vlgmr.msrb.gmra.mxu1 %v1538_v59  ;;  %731 = vmatpush.msrb.mxu0 %v367_v58  ;;  %v331_v40 = vld [vmem:[#allocation8 + $0xd0] sm:$0xff] }
  0xbf   :  { %751 = vmatpush.msrb.mxu1 %v431_v0  ;;  %v290_v8 = vadd.f32 %v1230_v47, %v289_v3  ;;  %v395_v41 = vld [vmem:[#allocation8 + $0x2d0] sm:$0xff] }
  0xc0   :  { %v279_v7 = vsel %vm278_vm13, %v1228_v42, %v275_v2  ;;  %732 = vmatpush.msrb.mxu0 %v363_v60  ;;  %v471_v42 = vld [vmem:[#allocation8 + $0x530] sm:$0xff] }
  0xc1   :  { %v284_v10 = vsel %vm281_vm14, %v283_v5, %v279_v7  ;;  %752 = vmatpush.msrb.mxu1 %v427_v61  ;;  %v294_v14 = vsel %vm293_vm0, %v1230_v47, %v290_v8  ;;  %v535_v43 = vld [vmem:[#allocation8 + $0x730] sm:$0xff]  ;;  %v432_v7 = vld [vmem:[#allocation8 + $0x3f8] sm:$0xff] }
  0xc2   :  { %v1548_v13 = vmul.f32 %v284_v10, %v1518_v16  ;;  %733 = vmatpush.msrb.mxu0 %v359_v6  ;;  %v299_v19 = vsel %vm296_vm1, %v298_v11, %v294_v14  ;;  %v491_v16 = vld [vmem:[#allocation8 + $0x5d0] sm:$0xff]  ;;  %v368_v6 = vld [vmem:[#allocation8 + $0x1f8] sm:$0xff] }
  0xc3   :  { %753 = vmatpush.msrb.mxu1 %v423_v9  ;;  %v1551_v20 = vmul.f32 %v299_v19, %v1520_v17  ;;  %v411_v17 = vld [vmem:[#allocation8 + $0x350] sm:$0xff]  ;;  %v364_v10 = vld [vmem:[#allocation8 + $0x1d8] sm:$0xff] }
  0xc4   :  { %627 = vmatmul.f32.vlgmr.msrb.gmra.mxu2 %v1548_v13  ;;  %734 = vmatpush.msrb.mxu0 %v355_v12  ;;  %v327_v44 = vld [vmem:[#allocation8 + $0xb0] sm:$0xff]  ;;  %v428_v11 = vld [vmem:[#allocation8 + $0x3d8] sm:$0xff] }
  0xc5   :  { %754 = vmatpush.msrb.mxu1 %v419_v15  ;;  %771 = vmatpush.msrb.mxu2 %v495_v18  ;;  %v391_v45 = vld [vmem:[#allocation8 + $0x2b0] sm:$0xff]  ;;  %v360_v15 = vld [vmem:[#allocation8 + $0x1b8] sm:$0xff] }
  0xc6   :  { %647 = vmatmul.f32.vlgmr.msrb.gmra.mxu3 %v1551_v20  ;;  %667 = vmatmul.f32.vlgmr.msra.gmra.mxu0 %v1533_v54  ;;  %v467_v46 = vld [vmem:[#allocation8 + $0x510] sm:$0xff]  ;;  %v424_v18 = vld [vmem:[#allocation8 + $0x3b8] sm:$0xff] }
  0xc7   :  { %791 = vmatpush.msrb.mxu3 %v559_v21  ;;  %687 = vmatmul.f32.vlgmr.msra.gmra.mxu1 %v1538_v59  ;;  %v531_v47 = vld [vmem:[#allocation8 + $0x710] sm:$0xff] }
  0xc8   :  { %735 = vmatpush.msrb.mxu0 %v351_v22  ;;  %755 = vmatpush.msrb.mxu1 %v415_v23  ;;  %v323_v48 = vld [vmem:[#allocation8 + $0x90] sm:$0xff]  ;;  %v356_v22 = vld [vmem:[#allocation8 + $0x198] sm:$0xff] }
  0xc9   :  { %772 = vmatpush.msrb.mxu2 %v491_v16  ;;  %792 = vmatpush.msrb.mxu3 %v555_v24  ;;  %v387_v49 = vld [vmem:[#allocation8 + $0x290] sm:$0xff]  ;;  %v420_v23 = vld [vmem:[#allocation8 + $0x398] sm:$0xff] }
  0xca   :  { %736 = vmatpush.msrb.mxu0 %v347_v25  ;;  %756 = vmatpush.msrb.mxu1 %v411_v17  ;;  %v463_v50 = vld [vmem:[#allocation8 + $0x4f0] sm:$0xff]  ;;  %v496_v16 = vld [vmem:[#allocation8 + $0x5f8] sm:$0xff] }
  0xcb   :  { %773 = vmatpush.msrb.mxu2 %v487_v26  ;;  %793 = vmatpush.msrb.mxu3 %v551_v27  ;;  %v527_v51 = vld [vmem:[#allocation8 + $0x6f0] sm:$0xff]  ;;  %v560_v24 = vld [vmem:[#allocation8 + $0x7f8] sm:$0xff] }
  0xcc   :  { %737 = vmatpush.msrb.mxu0 %v343_v28  ;;  %757 = vmatpush.msrb.mxu1 %v407_v29  ;;  %v319_v52 = vld [vmem:[#allocation8 + $0x70] sm:$0xff]  ;;  %v352_v25 = vld [vmem:[#allocation8 + $0x178] sm:$0xff] }
  0xcd   :  { %774 = vmatpush.msrb.mxu2 %v483_v30  ;;  %794 = vmatpush.msrb.mxu3 %v547_v31  ;;  %v383_v53 = vld [vmem:[#allocation8 + $0x270] sm:$0xff]  ;;  %v416_v17 = vld [vmem:[#allocation8 + $0x378] sm:$0xff] }
  0xce   :  { %707 = vmatmul.f32.vlgmr.msra.gmra.mxu2 %v1548_v13  ;;  %727 = vmatmul.f32.vlgmr.msra.gmra.mxu3 %v1551_v20  ;;  %v459_v55 = vld [vmem:[#allocation8 + $0x4d0] sm:$0xff]  ;;  %v492_v26 = vld [vmem:[#allocation8 + $0x5d8] sm:$0xff] }
  0xcf   :  { %738 = vmatpush.msrb.mxu0 %v339_v32  ;;  %758 = vmatpush.msrb.mxu1 %v403_v33  ;;  %v523_v56 = vld [vmem:[#allocation8 + $0x6d0] sm:$0xff]  ;;  %v556_v27 = vld [vmem:[#allocation8 + $0x7d8] sm:$0xff] }
  0xd0   :  { %775 = vmatpush.msrb.mxu2 %v479_v34  ;;  %795 = vmatpush.msrb.mxu3 %v543_v35  ;;  %v315_v57 = vld [vmem:[#allocation8 + $0x50] sm:$0xff]  ;;  %v348_v28 = vld [vmem:[#allocation8 + $0x158] sm:$0xff] }
  0xd1   :  { %739 = vmatpush.msrb.mxu0 %v335_v36  ;;  %759 = vmatpush.msrb.mxu1 %v399_v37  ;;  %v379_v58 = vld [vmem:[#allocation8 + $0x250] sm:$0xff]  ;;  %v412_v29 = vld [vmem:[#allocation8 + $0x358] sm:$0xff] }
  0xd2   :  { %776 = vmatpush.msrb.mxu2 %v475_v38  ;;  %796 = vmatpush.msrb.mxu3 %v539_v39  ;;  %v455_v62 = vld [vmem:[#allocation8 + $0x4b0] sm:$0xff]  ;;  %v488_v30 = vld [vmem:[#allocation8 + $0x5b8] sm:$0xff] }
  0xd3   :  { %740 = vmatpush.msrb.mxu0 %v331_v40  ;;  %760 = vmatpush.msrb.mxu1 %v395_v41  ;;  %v519_v63 = vld [vmem:[#allocation8 + $0x6b0] sm:$0xff]  ;;  %v552_v31 = vld [vmem:[#allocation8 + $0x7b8] sm:$0xff] }
  0xd4   :  { %777 = vmatpush.msrb.mxu2 %v471_v42  ;;  %797 = vmatpush.msrb.mxu3 %v535_v43  ;;  %v311_v0 = vld [vmem:[#allocation8 + $0x30] sm:$0xff]  ;;  %v344_v32 = vld [vmem:[#allocation8 + $0x138] sm:$0xff] }
  0xd5   :  { %741 = vmatpush.msrb.mxu0 %v327_v44  ;;  %761 = vmatpush.msrb.mxu1 %v391_v45  ;;  %v375_v1 = vld [vmem:[#allocation8 + $0x230] sm:$0xff]  ;;  %v408_v33 = vld [vmem:[#allocation8 + $0x338] sm:$0xff] }
  0xd6   :  { %778 = vmatpush.msrb.mxu2 %v467_v46  ;;  %798 = vmatpush.msrb.mxu3 %v531_v47  ;;  %v451_v60 = vld [vmem:[#allocation8 + $0x490] sm:$0xff]  ;;  %v484_v34 = vld [vmem:[#allocation8 + $0x598] sm:$0xff] }
  0xd7   :  { %742 = vmatpush.msrb.mxu0 %v323_v48  ;;  %762 = vmatpush.msrb.mxu1 %v387_v49  ;;  %v515_v2 = vld [vmem:[#allocation8 + $0x690] sm:$0xff]  ;;  %v548_v35 = vld [vmem:[#allocation8 + $0x798] sm:$0xff] }
  0xd8   :  { %779 = vmatpush.msrb.mxu2 %v463_v50  ;;  %799 = vmatpush.msrb.mxu3 %v527_v51  ;;  %v307_v3 = vld [vmem:[#allocation8 + $0x10] sm:$0xff]  ;;  %v340_v36 = vld [vmem:[#allocation8 + $0x118] sm:$0xff] }
  0xd9   :  { %743 = vmatpush.msrb.mxu0 %v319_v52  ;;  %763 = vmatpush.msrb.mxu1 %v383_v53  ;;  %v371_v4 = vld [vmem:[#allocation8 + $0x210] sm:$0xff]  ;;  %v404_v37 = vld [vmem:[#allocation8 + $0x318] sm:$0xff] }
  0xda   :  { %780 = vmatpush.msrb.mxu2 %v459_v55  ;;  %800 = vmatpush.msrb.mxu3 %v523_v56  ;;  %v447_v61 = vld [vmem:[#allocation8 + $0x470] sm:$0xff]  ;;  %v480_v38 = vld [vmem:[#allocation8 + $0x578] sm:$0xff] }
  0xdb   :  { %744 = vmatpush.msrb.mxu0 %v315_v57  ;;  %764 = vmatpush.msrb.mxu1 %v379_v58  ;;  %v511_v5 = vld [vmem:[#allocation8 + $0x670] sm:$0xff]  ;;  %v544_v39 = vld [vmem:[#allocation8 + $0x778] sm:$0xff] }
  0xdc   :  { %781 = vmatpush.msrb.mxu2 %v455_v62  ;;  %801 = vmatpush.msrb.mxu3 %v519_v63  ;;  %v443_v8 = vld [vmem:[#allocation8 + $0x450] sm:$0xff]  ;;  %v336_v40 = vld [vmem:[#allocation8 + $0xf8] sm:$0xff] }
  0xdd   :  { %745 = vmatpush.msrb.mxu0 %v311_v0  ;;  %765 = vmatpush.msrb.mxu1 %v375_v1  ;;  %v507_v9 = vld [vmem:[#allocation8 + $0x650] sm:$0xff]  ;;  %v400_v41 = vld [vmem:[#allocation8 + $0x2f8] sm:$0xff] }
  0xde   :  { %782 = vmatpush.msrb.mxu2 %v451_v60  ;;  %802 = vmatpush.msrb.mxu3 %v515_v2  ;;  %v439_v12 = vld [vmem:[#allocation8 + $0x430] sm:$0xff]  ;;  %v476_v42 = vld [vmem:[#allocation8 + $0x558] sm:$0xff] }
  0xdf   :  { %746 = vmatpush.msrb.mxu0 %v307_v3  ;;  %766 = vmatpush.msrb.mxu1 %v371_v4  ;;  %v503_v14 = vld [vmem:[#allocation8 + $0x630] sm:$0xff]  ;;  %v540_v43 = vld [vmem:[#allocation8 + $0x758] sm:$0xff] }
  0xe0   :  { %783 = vmatpush.msrb.mxu2 %v447_v61  ;;  %803 = vmatpush.msrb.mxu3 %v511_v5  ;;  %v435_v19 = vld [vmem:[#allocation8 + $0x410] sm:$0xff]  ;;  %v332_v44 = vld [vmem:[#allocation8 + $0xd8] sm:$0xff] }
  0xe1   :  { %747 = vmatmul.f32.vlgmr.msrb.gmra.mxu0 %v1533_v54  ;;  %767 = vmatmul.f32.vlgmr.msrb.gmra.mxu1 %v1538_v59  ;;  %v499_v21 = vld [vmem:[#allocation8 + $0x610] sm:$0xff]  ;;  %v396_v45 = vld [vmem:[#allocation8 + $0x2d8] sm:$0xff] }
  0xe2   :  { %811 = vmatpush.msra.mxu0 %v368_v6  ;;  %831 = vmatpush.msra.mxu1 %v432_v7  ;;  %v472_v46 = vld [vmem:[#allocation8 + $0x538] sm:$0xff] }
  0xe3   :  { %784 = vmatpush.msrb.mxu2 %v443_v8  ;;  %804 = vmatpush.msrb.mxu3 %v507_v9  ;;  %v536_v47 = vld [vmem:[#allocation8 + $0x738] sm:$0xff] }
  0xe4   :  { %812 = vmatpush.msra.mxu0 %v364_v10  ;;  %832 = vmatpush.msra.mxu1 %v428_v11  ;;  %v328_v48 = vld [vmem:[#allocation8 + $0xb8] sm:$0xff] }
  0xe5   :  { %785 = vmatpush.msrb.mxu2 %v439_v12  ;;  %805 = vmatpush.msrb.mxu3 %v503_v14  ;;  %v392_v49 = vld [vmem:[#allocation8 + $0x2b8] sm:$0xff] }
  0xe6   :  { %813 = vmatpush.msra.mxu0 %v360_v15  ;;  %833 = vmatpush.msra.mxu1 %v424_v18  ;;  %v468_v50 = vld [vmem:[#allocation8 + $0x518] sm:$0xff] }
  0xe7   :  { %786 = vmatpush.msrb.mxu2 %v435_v19  ;;  %806 = vmatpush.msrb.mxu3 %v499_v21  ;;  %v532_v51 = vld [vmem:[#allocation8 + $0x718] sm:$0xff] }
  0xe8   :  { %787 = vmatmul.f32.vlgmr.msrb.gmra.mxu2 %v1548_v13  ;;  %807 = vmatmul.f32.vlgmr.msrb.gmra.mxu3 %v1551_v20  ;;  %v324_v52 = vld [vmem:[#allocation8 + $0x98] sm:$0xff] }
  0xe9   :  { %814 = vmatpush.msra.mxu0 %v356_v22  ;;  %834 = vmatpush.msra.mxu1 %v420_v23  ;;  %v388_v53 = vld [vmem:[#allocation8 + $0x298] sm:$0xff] }
  0xea   :  { %851 = vmatpush.msra.mxu2 %v496_v16  ;;  %871 = vmatpush.msra.mxu3 %v560_v24  ;;  %v464_v55 = vld [vmem:[#allocation8 + $0x4f8] sm:$0xff]  ;;  %v1567_v16 = vld [vmem:[#allocation10] sm:$0xf] }
  0xeb   :  { %815 = vmatpush.msra.mxu0 %v352_v25  ;;  %835 = vmatpush.msra.mxu1 %v416_v17  ;;  %v528_v56 = vld [vmem:[#allocation8 + $0x6f8] sm:$0xff]  ;;  %v563_v17 = vperm.slane %v1567_v16, 0 }
  0xec   :  { %852 = vmatpush.msra.mxu2 %v492_v26  ;;  %872 = vmatpush.msra.mxu3 %v556_v27  ;;  %v320_v57 = vld [vmem:[#allocation8 + $0x78] sm:$0xff]  ;;  %v979_v27 = vld [vmem:[#allocation11 + $0x40] sm:$0xff] }
  0xed   :  { %816 = vmatpush.msra.mxu0 %v348_v28  ;;  %836 = vmatpush.msra.mxu1 %v412_v29  ;;  %v384_v58 = vld [vmem:[#allocation8 + $0x278] sm:$0xff]  ;;  %v999_v28 = vld [vmem:[#allocation11 + $0xe0] sm:$0xff] }
  0xee   :  { %853 = vmatpush.msra.mxu2 %v488_v30  ;;  %873 = vmatpush.msra.mxu3 %v552_v31  ;;  %v460_v62 = vld [vmem:[#allocation8 + $0x4d8] sm:$0xff] }
  0xef   :  { %817 = vmatpush.msra.mxu0 %v344_v32  ;;  %837 = vmatpush.msra.mxu1 %v408_v33  ;;  %v524_v63 = vld [vmem:[#allocation8 + $0x6d8] sm:$0xff] }
  0xf0   :  { %854 = vmatpush.msra.mxu2 %v484_v34  ;;  %874 = vmatpush.msra.mxu3 %v548_v35  ;;  %v316_v0 = vld [vmem:[#allocation8 + $0x58] sm:$0xff]  ;;  %v976_v35 = vld [vmem:[#allocation11 + $0x28] sm:$0xff] }
  0xf1   :  { %818 = vmatpush.msra.mxu0 %v340_v36  ;;  %838 = vmatpush.msra.mxu1 %v404_v37  ;;  %v380_v1 = vld [vmem:[#allocation8 + $0x258] sm:$0xff]  ;;  %v996_v36 = vld [vmem:[#allocation11 + $0xc8] sm:$0xff] }
  0xf2   :  { %855 = vmatpush.msra.mxu2 %v480_v38  ;;  %875 = vmatpush.msra.mxu3 %v544_v39  ;;  %v456_v60 = vld [vmem:[#allocation8 + $0x4b8] sm:$0xff]  ;;  %v975_v39 = vld [vmem:[#allocation11 + $0x20] sm:$0xff] }
  0xf3   :  { %819 = vmatpush.msra.mxu0 %v336_v40  ;;  %839 = vmatpush.msra.mxu1 %v400_v41  ;;  %v520_v2 = vld [vmem:[#allocation8 + $0x6b8] sm:$0xff]  ;;  %v995_v40 = vld [vmem:[#allocation11 + $0xc0] sm:$0xff]  ;;  %v564_v41 = vperm.slane %v1567_v16, 1 }
  0xf4   :  { %856 = vmatpush.msra.mxu2 %v476_v42  ;;  %876 = vmatpush.msra.mxu3 %v540_v43  ;;  %v312_v3 = vld [vmem:[#allocation8 + $0x38] sm:$0xff] }
  0xf5   :  { %820 = vmatpush.msra.mxu0 %v332_v44  ;;  %840 = vmatpush.msra.mxu1 %v396_v45  ;;  %v376_v4 = vld [vmem:[#allocation8 + $0x238] sm:$0xff] }
  0xf6   :  { %857 = vmatpush.msra.mxu2 %v472_v46  ;;  %877 = vmatpush.msra.mxu3 %v536_v47  ;;  %v452_v61 = vld [vmem:[#allocation8 + $0x498] sm:$0xff] }
  0xf7   :  { %821 = vmatpush.msra.mxu0 %v328_v48  ;;  %841 = vmatpush.msra.mxu1 %v392_v49  ;;  %v516_v5 = vld [vmem:[#allocation8 + $0x698] sm:$0xff] }
  0xf8   :  { %858 = vmatpush.msra.mxu2 %v468_v50  ;;  %878 = vmatpush.msra.mxu3 %v532_v51  ;;  %v308_v6 = vld [vmem:[#allocation8 + $0x18] sm:$0xff] }
  0xf9   :  { %822 = vmatpush.msra.mxu0 %v324_v52  ;;  %842 = vmatpush.msra.mxu1 %v388_v53  ;;  %v372_v7 = vld [vmem:[#allocation8 + $0x218] sm:$0xff]  ;;  %v972_v52 = vld [vmem:[#allocation11 + $0x8] sm:$0xff] }
  0xfa   :  { %859 = vmatpush.msra.mxu2 %v464_v55  ;;  %879 = vmatpush.msra.mxu3 %v528_v56  ;;  %v448_v8 = vld [vmem:[#allocation8 + $0x478] sm:$0xff]  ;;  %v992_v53 = vld [vmem:[#allocation11 + $0xa8] sm:$0xff]  ;;  %v971_v56 = vld [vmem:[#allocation11] sm:$0xff] }
  0xfb   :  { %823 = vmatpush.msra.mxu0 %v320_v57  ;;  %843 = vmatpush.msra.mxu1 %v384_v58  ;;  %v512_v9 = vld [vmem:[#allocation8 + $0x678] sm:$0xff]  ;;  %v991_v57 = vld [vmem:[#allocation11 + $0xa0] sm:$0xff] }
  0xfc   :  { %860 = vmatpush.msra.mxu2 %v460_v62  ;;  %880 = vmatpush.msra.mxu3 %v524_v63  ;;  %v444_v10 = vld [vmem:[#allocation8 + $0x458] sm:$0xff] }
  0xfd   :  { %824 = vmatpush.msra.mxu0 %v316_v0  ;;  %844 = vmatpush.msra.mxu1 %v380_v1  ;;  %v508_v11 = vld [vmem:[#allocation8 + $0x658] sm:$0xff] }
  0xfe   :  { %861 = vmatpush.msra.mxu2 %v456_v60  ;;  %881 = vmatpush.msra.mxu3 %v520_v2  ;;  %v440_v12 = vld [vmem:[#allocation8 + $0x438] sm:$0xff] }
  0xff   :  { %825 = vmatpush.msra.mxu0 %v312_v3  ;;  %845 = vmatpush.msra.mxu1 %v376_v4  ;;  %v504_v14 = vld [vmem:[#allocation8 + $0x638] sm:$0xff] }
 0x100   :  { %862 = vmatpush.msra.mxu2 %v452_v61  ;;  %882 = vmatpush.msra.mxu3 %v516_v5  ;;  %v436_v15 = vld [vmem:[#allocation8 + $0x418] sm:$0xff]  ;;  %v1016_v5 = vld [vmem:[#allocation11 + $0x168] sm:$0xff] }
 0x101   :  { %826 = vmatpush.msra.mxu0 %v308_v6  ;;  %846 = vmatpush.msra.mxu1 %v372_v7  ;;  %v500_v18 = vld [vmem:[#allocation8 + $0x618] sm:$0xff]  ;;  %v988_v7 = vld [vmem:[#allocation11 + $0x88] sm:$0xff] }
 0x102   :  { %863 = vmatpush.msra.mxu2 %v448_v8  ;;  %883 = vmatpush.msra.mxu3 %v512_v9  ;;  %v986_v19 = vld [vmem:[#allocation11 + $0x78] sm:$0xff]  ;;  %v985_v21 = vld [vmem:[#allocation11 + $0x70] sm:$0xff]  ;;  %v1015_v9 = vld [vmem:[#allocation11 + $0x160] sm:$0xff] }
 0x103   :  { %827 = vmatmul.f32.vlgmr.msra.gmra.mxu0 %v1533_v54  ;;  %847 = vmatmul.f32.vlgmr.msra.gmra.mxu1 %v1538_v59  ;;  %v984_v54 = vld [vmem:[#allocation11 + $0x68] sm:$0xff]  ;;  %v983_v59 = vld [vmem:[#allocation11 + $0x60] sm:$0xff]  ;;  %v982_v22 = vld [vmem:[#allocation11 + $0x58] sm:$0xff] }
 0x104   :  { %864 = vmatpush.msra.mxu2 %v444_v10  ;;  %884 = vmatpush.msra.mxu3 %v508_v11  ;;  %v1002_v23 = vld [vmem:[#allocation11 + $0xf8] sm:$0xff]  ;;  %v981_v24 = vld [vmem:[#allocation11 + $0x50] sm:$0xff]  ;;  %v987_v10 = vld [vmem:[#allocation11 + $0x80] sm:$0xff] }
 0x105   :  { %1039 = vmatpush.msrb.mxu0 %v986_v19  ;;  %1059 = vmatpush.msrb.mxu1 %v1002_v23  ;;  %v1001_v25 = vld [vmem:[#allocation11 + $0xf0] sm:$0xff]  ;;  %v978_v29 = vld [vmem:[#allocation11 + $0x38] sm:$0xff] }
 0x106   :  { %865 = vmatpush.msra.mxu2 %v440_v12  ;;  %885 = vmatpush.msra.mxu3 %v504_v14  ;;  %v998_v30 = vld [vmem:[#allocation11 + $0xd8] sm:$0xff]  ;;  %v977_v32 = vld [vmem:[#allocation11 + $0x30] sm:$0xff]  ;;  %v1012_v14 = vld [vmem:[#allocation11 + $0x148] sm:$0xff] }
 0x107   :  { %1040 = vmatpush.msrb.mxu0 %v985_v21  ;;  %1060 = vmatpush.msrb.mxu1 %v1001_v25  ;;  %v997_v33 = vld [vmem:[#allocation11 + $0xd0] sm:$0xff]  ;;  %v974_v45 = vld [vmem:[#allocation11 + $0x18] sm:$0xff]  ;;  %v1011_v21 = vld [vmem:[#allocation11 + $0x140] sm:$0xff] }
 0x108   :  { %866 = vmatpush.msra.mxu2 %v436_v15  ;;  %886 = vmatpush.msra.mxu3 %v500_v18  ;;  %v994_v46 = vld [vmem:[#allocation11 + $0xb8] sm:$0xff]  ;;  %v973_v48 = vld [vmem:[#allocation11 + $0x10] sm:$0xff] }
 0x109   :  { %867 = vmatmul.f32.vlgmr.msra.gmra.mxu2 %v1548_v13  ;;  %887 = vmatmul.f32.vlgmr.msra.gmra.mxu3 %v1551_v20  ;;  %v980_v13 = vld [vmem:[#allocation11 + $0x48] sm:$0xff]  ;;  %v993_v49 = vld [vmem:[#allocation11 + $0xb0] sm:$0xff]  ;;  %v1018_v62 = vld [vmem:[#allocation11 + $0x178] sm:$0xff] }
 0x10a   :  { %1041 = vmatpush.msrb.mxu0 %v984_v54  ;;  %v1000_v20 = vld [vmem:[#allocation11 + $0xe8] sm:$0xff]  ;;  %1079 = vmatpush.msrb.mxu2 %v1018_v62  ;;  %v990_v0 = vld [vmem:[#allocation11 + $0x98] sm:$0xff]  ;;  %v1017_v60 = vld [vmem:[#allocation11 + $0x170] sm:$0xff] }
 0x10b   :  { %1061 = vmatpush.msrb.mxu1 %v1000_v20  ;;  %v989_v3 = vld [vmem:[#allocation11 + $0x90] sm:$0xff]  ;;  %v1014_v11 = vld [vmem:[#allocation11 + $0x158] sm:$0xff]  ;;  %v1032_v62 = vld [vmem:[#allocation11 + $0x1e8] sm:$0xff] }
 0x10c   :  { %1042 = vmatpush.msrb.mxu0 %v983_v59  ;;  %1080 = vmatpush.msrb.mxu2 %v1017_v60  ;;  %v1013_v12 = vld [vmem:[#allocation11 + $0x150] sm:$0xff] }
 0x10d   :  { %1062 = vmatpush.msrb.mxu1 %v999_v28  ;;  %v1009_v20 = vld [vmem:[#allocation11 + $0x130] sm:$0xff] }
 0x10e   :  { %1043 = vmatpush.msrb.mxu0 %v982_v22  ;;  %1081 = vmatpush.msrb.mxu2 %v1016_v5  ;;  %v1010_v22 = vld [vmem:[#allocation11 + $0x138] sm:$0xff] }
 0x10f   :  { %1063 = vmatpush.msrb.mxu1 %v998_v30  ;;  %v1026_v5 = vld [vmem:[#allocation11 + $0x1b8] sm:$0xff] }
 0x110   :  { %1044 = vmatpush.msrb.mxu0 %v981_v24  ;;  %1082 = vmatpush.msrb.mxu2 %v1015_v9  ;;  %v1024_v9 = vld [vmem:[#allocation11 + $0x1a8] sm:$0xff] }
 0x111   :  { %1064 = vmatpush.msrb.mxu1 %v997_v33 }
 0x112   :  { %1045 = vmatpush.msrb.mxu0 %v980_v13  ;;  %1083 = vmatpush.msrb.mxu2 %v1014_v11  ;;  %v565_v13 = vperm.slane %v1567_v16, 2 }
 0x113   :  { %1065 = vmatpush.msrb.mxu1 %v996_v36  ;;  %v1006_v36 = vld [vmem:[#allocation11 + $0x118] sm:$0xff] }
 0x114   :  { %1046 = vmatpush.msrb.mxu0 %v979_v27  ;;  %1084 = vmatpush.msrb.mxu2 %v1013_v12  ;;  %v1008_v27 = vld [vmem:[#allocation11 + $0x128] sm:$0xff] }
 0x115   :  { %1066 = vmatpush.msrb.mxu1 %v995_v40  ;;  %v1005_v40 = vld [vmem:[#allocation11 + $0x110] sm:$0xff] }
 0x116   :  { %1047 = vmatpush.msrb.mxu0 %v978_v29  ;;  %1085 = vmatpush.msrb.mxu2 %v1012_v14  ;;  %v1023_v14 = vld [vmem:[#allocation11 + $0x1a0] sm:$0xff] }
 0x117   :  { %1067 = vmatpush.msrb.mxu1 %v994_v46  ;;  %v1004_v46 = vld [vmem:[#allocation11 + $0x108] sm:$0xff] }
 0x118   :  { %1048 = vmatpush.msrb.mxu0 %v977_v32  ;;  %1086 = vmatpush.msrb.mxu2 %v1011_v21  ;;  %v1022_v21 = vld [vmem:[#allocation11 + $0x198] sm:$0xff] }
 0x119   :  { %1068 = vmatpush.msrb.mxu1 %v993_v49 }
 0x11a   :  { %1049 = vmatpush.msrb.mxu0 %v976_v35  ;;  %1087 = vmatpush.msrb.mxu2 %v1010_v22  ;;  %v1021_v22 = vld [vmem:[#allocation11 + $0x190] sm:$0xff] }
 0x11b   :  { %1069 = vmatpush.msrb.mxu1 %v992_v53 }
 0x11c   :  { %1050 = vmatpush.msrb.mxu0 %v975_v39  ;;  %1088 = vmatpush.msrb.mxu2 %v1009_v20 }
 0x11d   :  { %1070 = vmatpush.msrb.mxu1 %v991_v57  ;;  %v1033_v57 = vld [vmem:[#allocation11 + $0x1f0] sm:$0xff] }
 0x11e   :  { %1051 = vmatpush.msrb.mxu0 %v974_v45  ;;  %1089 = vmatpush.msrb.mxu2 %v1008_v27  ;;  %v1019_v27 = vld [vmem:[#allocation11 + $0x180] sm:$0xff] }
 0x11f   :  { %1071 = vmatpush.msrb.mxu1 %v990_v0  ;;  %v1030_v0 = vld [vmem:[#allocation11 + $0x1d8] sm:$0xff] }
 0x120   :  { %1052 = vmatpush.msrb.mxu0 %v973_v48 }
 0x121   :  { %1072 = vmatpush.msrb.mxu1 %v989_v3  ;;  %v1028_v3 = vld [vmem:[#allocation11 + $0x1c8] sm:$0xff] }
 0x122   :  { %1053 = vmatpush.msrb.mxu0 %v972_v52  ;;  %v1034_v52 = vld [vmem:[#allocation11 + $0x1f8] sm:$0xff] }
 0x123   :  { %1073 = vmatpush.msrb.mxu1 %v988_v7  ;;  %1099 = vmatpush.msrb.mxu3 %v1034_v52 }
 0x124   :  { %1054 = vmatpush.msrb.mxu0 %v971_v56 }
 0x125   :  { %1074 = vmatpush.msrb.mxu1 %v987_v10  ;;  %1100 = vmatpush.msrb.mxu3 %v1033_v57 }
 0x127   :  { %1101 = vmatpush.msrb.mxu3 %v1032_v62 }
 0x13a   :  { %v588_v26 = vpop.f32.mrf.mxu0 }
 0x13b   :  { %v589_v31 = vadd.f32 %v588_v26, %v563_v17  ;;  %v608_v34 = vpop.f32.mrf.mxu1 }
 0x13d   :  { %v609_v37 = vadd.f32 %v608_v34, %v589_v31  ;;  %v1007_v31 = vld [vmem:[#allocation11 + $0x120] sm:$0xff] }
 0x13e   :  { %1090 = vmatpush.msrb.mxu2 %v1007_v31 }
 0x140   :  { %1091 = vmatpush.msrb.mxu2 %v1006_v36 }
 0x142   :  { %1092 = vmatpush.msrb.mxu2 %v1005_v40 }
 0x143   :  { %v668_v43 = vpop.f32.mrf.mxu0 }
 0x144   :  { %v669_v50 = vadd.f32 %v668_v43, %v564_v41  ;;  %v688_v55 = vpop.f32.mrf.mxu1  ;;  %1093 = vmatpush.msrb.mxu2 %v1004_v46 }
 0x146   :  { %v689_v58 = vadd.f32 %v688_v55, %v669_v50  ;;  %v1003_v50 = vld [vmem:[#allocation11 + $0x100] sm:$0xff] }
 0x147   :  { %v628_v38 = vpop.f32.mrf.mxu2  ;;  %1094 = vmatpush.msrb.mxu2 %v1003_v50 }
 0x148   :  { %v629_v42 = vadd.f32 %v628_v38, %v609_v37 }
 0x149   :  { %v648_v44 = vpop.f32.mrf.mxu3 }
 0x14a   :  { %v1571_v47 = vadd.f32 %v648_v44, %v629_v42 }
 0x14c   :  { %v1198_v51 = vmul.f32 -1.442695, %v1571_v47 }
 0x14e   :  { %1231 = vpow2.f32 %v1198_v51 }
 0x151   :  { %v708_v63 = vpop.f32.mrf.mxu2  ;;  %v728_v2 = vpop.f32.mrf.mxu3 }
 0x152   :  { %v709_v1 = vadd.f32 %v708_v63, %v689_v58  ;;  %v1031_v63 = vld [vmem:[#allocation11 + $0x1e0] sm:$0xff] }
 0x153   :  { %1102 = vmatpush.msrb.mxu3 %v1031_v63 }
 0x154   :  { %v1232_v4 = vpop.eup %1231  ;;  %v1574_v61 = vadd.f32 %v728_v2, %v709_v1  ;;  %v1029_v2 = vld [vmem:[#allocation11 + $0x1d0] sm:$0xff] }
 0x155   :  { %v903_v6 = vadd.f32 1.0, %v1232_v4  ;;  %1103 = vmatpush.msrb.mxu3 %v1030_v0  ;;  %v1027_v4 = vld [vmem:[#allocation11 + $0x1c0] sm:$0xff] }
 0x156   :  { %v1199_v8 = vmul.f32 -1.442695, %v1574_v61 }
 0x157   :  { %1233 = vrcp.f32 %v903_v6  ;;  %v918_v23 = vand.u32 2147483648, %v903_v6  ;;  %v916_v25 = vand.u32 2147483647, %v903_v6  ;;  %vm912_vm3 = vweird.f32 %v903_v6  ;;  %1104 = vmatpush.msrb.mxu3 %v1029_v2 }
 0x158   :  { %1235 = vpow2.f32 %v1199_v8  ;;  %v566_v8 = vperm.slane %v1567_v16, 3 }
 0x159   :  { %v919_v28 = vor.u32 1.1754944e-38, %v918_v23  ;;  %vm917_vm5 = vcmp.eq.f32.partialorder %v916_v25, 8.507059e+37  ;;  %1105 = vmatpush.msrb.mxu3 %v1028_v3 }
 0x15b   :  { %1106 = vmatpush.msrb.mxu3 %v1027_v4 }
 0x15d   :  { %v1234_v15 = vpop.eup %1233  ;;  %1107 = vmatpush.msrb.mxu3 %v1026_v5 }
 0x15e   :  { %v1236_v18 = vpop.eup %1235  ;;  %v908_v19 = vmul.f32 %v1234_v15, %v903_v6  ;;  %vm913_vm2 = vweird.f32 %v1234_v15  ;;  %v748_v17 = vpop.f32.mrf.mxu0  ;;  %v1025_v6 = vld [vmem:[#allocation11 + $0x1b0] sm:$0xff] }
 0x15f   :  { %v904_v54 = vadd.f32 1.0, %v1236_v18  ;;  %vm914_vm4 = vmor %vm912_vm3, %vm913_vm2  ;;  %v749_v30 = vadd.f32 %v748_v17, %v565_v13  ;;  %v768_v37 = vpop.f32.mrf.mxu1  ;;  %1108 = vmatpush.msrb.mxu3 %v1025_v6  ;;  %v1020_v13 = vld [vmem:[#allocation11 + $0x188] sm:$0xff] }
 0x160   :  { %v909_v59 = vsub.f32 1.0, %v908_v19 }
 0x161   :  { %1237 = vrcp.f32 %v904_v54  ;;  %v769_v39 = vadd.f32 %v768_v37, %v749_v30  ;;  %v933_v41 = vand.u32 2147483648, %v904_v54  ;;  %v931_v44 = vand.u32 2147483647, %v904_v54  ;;  %1109 = vmatpush.msrb.mxu3 %v1024_v9 }
 0x162   :  { %v910_v24 = vmul.f32 %v1234_v15, %v909_v59  ;;  %vm927_vm7 = vweird.f32 %v904_v54 }
 0x163   :  { %v934_v51 = vor.u32 1.1754944e-38, %v933_v41  ;;  %vm932_vm9 = vcmp.eq.f32.partialorder %v931_v44, 8.507059e+37  ;;  %1110 = vmatpush.msrb.mxu3 %v1023_v14  ;;  %v1214_v44 = vld [vmem:[%s1597_s6] ss:$0 sm:$0xff]  ;;  %s1443_s6 = smov [#allocation13]  }
 0x164   :  { %v911_v26 = vadd.f32 %v1234_v15, %v910_v24  ;;  %s1171_s8 = sshll.u32 %s1443_s6, 4  ;;  %s1172_s8 = int_to_ptr.vmem [resolvable:$true] %s1171_s8 }
 0x165   :  { %1111 = vmatpush.msrb.mxu3 %v1022_v21 }
 0x166   :  { %v915_v29 = vsel %vm914_vm4, %v1234_v15, %v911_v26 }
 0x167   :  { %v1238_v32 = vpop.eup %1237  ;;  %v920_v33 = vsel %vm917_vm5, %v919_v28, %v915_v29  ;;  %1112 = vmatpush.msrb.mxu3 %v1021_v22 }
 0x168   :  { %v967_v34 = vmul.f32 %v920_v33, %v1571_v47  ;;  %v923_v35 = vmul.f32 %v1238_v32, %v904_v54  ;;  %vm928_vm6 = vweird.f32 %v1238_v32 }
 0x169   :  { %vm929_vm8 = vmor %vm927_vm7, %vm928_vm6  ;;  %1113 = vmatpush.msrb.mxu3 %v1020_v13 }
 0x16a   :  { %v924_v38 = vsub.f32 1.0, %v923_v35  ;;  %1055 = vmatmul.f32.vlgmr.msrb.gmra.mxu0 %v967_v34 }
 0x16b   :  { %v788_v42 = vpop.f32.mrf.mxu2  ;;  %v808_v48 = vpop.f32.mrf.mxu3  ;;  %1114 = vmatpush.msrb.mxu3 %v1019_v27 }
 0x16c   :  { %v925_v43 = vmul.f32 %v1238_v32, %v924_v38  ;;  %v789_v45 = vadd.f32 %v788_v42, %v769_v39 }
 0x16e   :  { %v926_v49 = vadd.f32 %v1238_v32, %v925_v43  ;;  %v1579_v47 = vadd.f32 %v808_v48, %v789_v45 }
 0x170   :  { %v930_v53 = vsel %vm929_vm8, %v1238_v32, %v926_v49  ;;  %v1200_v55 = vmul.f32 -1.442695, %v1579_v47 }
 0x171   :  { %v935_v56 = vsel %vm932_vm9, %v934_v51, %v930_v53 }
 0x172   :  { %v968_v58 = vmul.f32 %v935_v56, %v1574_v61  ;;  %1239 = vpow2.f32 %v1200_v55 }
 0x174   :  { %1075 = vmatmul.f32.vlgmr.msrb.gmra.mxu1 %v968_v58 }
 0x178   :  { %v1240_v1 = vpop.eup %1239 }
 0x179   :  { %v905_v60 = vadd.f32 1.0, %v1240_v1 }
 0x17b   :  { %1241 = vrcp.f32 %v905_v60  ;;  %v948_v12 = vand.u32 2147483648, %v905_v60  ;;  %v946_v18 = vand.u32 2147483647, %v905_v60  ;;  %vm942_vm11 = vweird.f32 %v905_v60 }
 0x17d   :  { %v949_v59 = vor.u32 1.1754944e-38, %v948_v12  ;;  %vm947_vm13 = vcmp.eq.f32.partialorder %v946_v18, 8.507059e+37  ;;  %v1159_v18 = vlaneseq }
 0x180   :  { %v828_v11 = vpop.f32.mrf.mxu0  ;;  %v848_v16 = vpop.f32.mrf.mxu1 }
 0x181   :  { %v1242_v61 = vpop.eup %1241  ;;  %v829_v19 = vadd.f32 %v828_v11, %v566_v8 }
 0x182   :  { %v938_v7 = vmul.f32 %v1242_v61, %v905_v60  ;;  %vm943_vm10 = vweird.f32 %v1242_v61 }
 0x183   :  { %vm944_vm12 = vmor %vm942_vm11, %vm943_vm10  ;;  %v849_v25 = vadd.f32 %v848_v16, %v829_v19 }
 0x184   :  { %v939_v10 = vsub.f32 1.0, %v938_v7 }
 0x186   :  { %v940_v15 = vmul.f32 %v1242_v61, %v939_v10 }
 0x188   :  { %v941_v54 = vadd.f32 %v1242_v61, %v940_v15 }
 0x18a   :  { %v945_v23 = vsel %vm944_vm12, %v1242_v61, %v941_v54  ;;  %v1160_v54 = vand.u32 127, %v1159_v18 }
 0x18b   :  { %v950_v24 = vsel %vm947_vm13, %v949_v59, %v945_v23 }
 0x18c   :  { %v969_v20 = vmul.f32 %v950_v24, %v1579_v47  ;;  %v868_v17 = vpop.f32.mrf.mxu2  ;;  %v888_v28 = vpop.f32.mrf.mxu3  ;;  %vm1161_vm5 = vcmp.ge.s32.totalorder %v1160_v54, 15  ;;  %vm1162_vm6 = vcmp.lt.s32.totalorder %v1160_v54, 30 }
 0x18d   :  { %v869_v26 = vadd.f32 %v868_v17, %v849_v25  ;;  %vm1163_vm8 = vmand %vm1161_vm5, %vm1162_vm6 }
 0x18e   :  { %1095 = vmatmul.f32.vlgmr.msrb.gmra.mxu2 %v969_v20 }
 0x18f   :  { %v889_v29 = vadd.f32 %v888_v28, %v869_v26 }
 0x191   :  { %v1201_v30 = vmul.f32 -1.442695, %v889_v29 }
 0x193   :  { %1243 = vpow2.f32 %v1201_v30 }
 0x199   :  { %v1244_v31 = vpop.eup %1243 }
 0x19a   :  { %v906_v32 = vadd.f32 1.0, %v1244_v31 }
 0x19c   :  { %1245 = vrcp.f32 %v906_v32  ;;  %v963_v36 = vand.u32 2147483648, %v906_v32  ;;  %v961_v38 = vand.u32 2147483647, %v906_v32  ;;  %vm957_vm15 = vweird.f32 %v906_v32 }
 0x19e   :  { %v964_v40 = vor.u32 1.1754944e-38, %v963_v36  ;;  %vm962_vm1 = vcmp.eq.f32.partialorder %v961_v38, 8.507059e+37 }
 0x1a2   :  { %v1246_v33 = vpop.eup %1245 }
 0x1a3   :  { %v953_v34 = vmul.f32 %v1246_v33, %v906_v32  ;;  %vm958_vm14 = vweird.f32 %v1246_v33 }
 0x1a4   :  { %vm959_vm0 = vmor %vm957_vm15, %vm958_vm14 }
 0x1a5   :  { %v954_v35 = vsub.f32 1.0, %v953_v34 }
 0x1a7   :  { %v955_v37 = vmul.f32 %v1246_v33, %v954_v35 }
 0x1a9   :  { %v956_v39 = vadd.f32 %v1246_v33, %v955_v37 }
 0x1ab   :  { %v960_v41 = vsel %vm959_vm0, %v1246_v33, %v956_v39 }
 0x1ac   :  { %v965_v42 = vsel %vm962_vm1, %v964_v40, %v960_v41 }
 0x1ad   :  { %v970_v43 = vmul.f32 %v965_v42, %v889_v29 }
 0x1af   :  { %1115 = vmatmul.f32.vlgmr.msrb.gmra.mxu3 %v970_v43 }
 0x1e7   :  { %v1056_v45 = vpop.f32.mrf.mxu0 }
 0x1e8   :  { %v1057_v48 = vadd.f32 %v1214_v44, %v1056_v45 }
 0x1f1   :  { %v1076_v46 = vpop.f32.mrf.mxu1 }
 0x1f2   :  { %v1077_v47 = vadd.f32 %v1076_v46, %v1057_v48 }
 0x211   :  { %v1096_v49 = vpop.f32.mrf.mxu2 }
 0x212   :  { %v1097_v50 = vadd.f32 %v1096_v49, %v1077_v47 }
 0x232   :  { %v1116_v51 = vpop.f32.mrf.mxu3 }
 0x233   :  { %v1117_v52 = vadd.f32 %v1116_v51, %v1097_v50 }
 0x235   :  { %v1119_v53 = vsub.f32 5.0, %v1117_v52 }
 0x237   :  { %v1123_v55 = vand.u32 2147483647, %v1119_v53  ;;  %v1120_v4 = vmax.f32 %v1119_v53, 0.0  ;;  %vm1121_vm3 = vcmp.ne.f32.partialorder %v1119_v53, %v1119_v53 }
 0x239   :  { %v1124_v56 = vsub.f32 0.0, %v1123_v55 }
 0x23b   :  { %v1125_v57 = vmul.f32 1.442695, %v1124_v56 }
 0x23d   :  { %1247 = vpow2.f32 %v1125_v57 }
 0x243   :  { %v1248_v58 = vpop.eup %1247 }
 0x244   :  { %v1127_v62 = vadd.f32 1.0, %v1248_v58  ;;  %v1130_v63 = vmul.f32 -0.5, %v1248_v58  ;;  %v1133_v1 = vand.u32 2147483647, %v1248_v58 }
 0x246   :  { %1249 = vlog2.f32 %v1127_v62  ;;  %v1131_v0 = vadd.f32 1.0, %v1130_v63  ;;  %vm1134_vm2 = vcmp.lt.f32.partialorder %v1133_v1, 0.0004427343 }
 0x248   :  { %v1132_v3 = vmul.f32 %v1248_v58, %v1131_v0 }
 0x24c   :  { %v1250_v60 = vpop.eup %1249 }
 0x24d   :  { %v1129_v2 = vmul.f32 0.6931472, %v1250_v60 }
 0x24f   :  { %v1135_v5 = vsel %vm1134_vm2, %v1132_v3, %v1129_v2 }
 0x250   :  { %v1136_v61 = vadd.f32 %v1135_v5, %v1120_v4 }
 0x252   :  { %v1137_v6 = vsel %vm1121_vm3, %v1119_v53, %v1136_v61 }
 0x253   :  { %v1138_v7 = vsub.f32 5.0, %v1137_v6 }
 0x255   :  { %v1202_v8 = vadd.f32 10.0, %v1138_v7 }
 0x257   :  { %v1143_v9 = vand.u32 2147483647, %v1202_v8  ;;  %v1140_v16 = vmax.f32 %v1202_v8, 0.0  ;;  %vm1141_vm7 = vcmp.ne.f32.partialorder %v1202_v8, %v1202_v8 }
 0x259   :  { %v1144_v10 = vsub.f32 0.0, %v1143_v9 }
 0x25b   :  { %v1145_v11 = vmul.f32 1.442695, %v1144_v10 }
 0x25d   :  { %1251 = vpow2.f32 %v1145_v11 }
 0x263   :  { %v1252_v12 = vpop.eup %1251 }
 0x264   :  { %v1147_v14 = vadd.f32 1.0, %v1252_v12  ;;  %v1150_v15 = vmul.f32 -0.5, %v1252_v12  ;;  %v1153_v21 = vand.u32 2147483647, %v1252_v12 }
 0x266   :  { %1253 = vlog2.f32 %v1147_v14  ;;  %v1151_v19 = vadd.f32 1.0, %v1150_v15  ;;  %vm1154_vm4 = vcmp.lt.f32.partialorder %v1153_v21, 0.0004427343 }
 0x268   :  { %v1152_v23 = vmul.f32 %v1252_v12, %v1151_v19 }
 0x26c   :  { %v1254_v59 = vpop.eup %1253 }
 0x26d   :  { %v1149_v22 = vmul.f32 0.6931472, %v1254_v59 }
 0x26f   :  { %v1155_v24 = vsel %vm1154_vm4, %v1152_v23, %v1149_v22 }
 0x270   :  { %v1156_v25 = vadd.f32 %v1155_v24, %v1140_v16 }
 0x272   :  { %v1157_v13 = vsel %vm1141_vm7, %v1202_v8, %v1156_v25 }
 0x273   :  { %v1158_v20 = vadd.f32 -10.0, %v1157_v13 }
 0x275   :  { %v1164_v17 = vsel %vm1163_vm8, %v1158_v20, %v1117_v52 }
 0x276   :  { %1165 = vst [vmem:[#allocation13] sm:$0xff] %v1164_v17 }
 0x277   :  { %1176 = dma.vmem_to_hbm [thread:$0]  %s1172_s8, 128, %s1174_s11, [#allocation4]  }
 0x278   :  { %1431 = dma.done.wait [#allocation4], 128  }
 0x279   :  { %1432 = vsyncadd [#allocation4], 4294967168 }
 0x27a   :  { %1181 = vsyncpa [#allocation3], 1 }
 0x27b   :  { %1182 = vsyncpa [#allocation6], 1 }
 0x27c   :  { %1183 = vsyncpa [#allocation9], 1 }
 0x27d   :  { %1184 = vsyncpa [#allocation12], 1 }
 0x27e   :  { %1185 = vsyncpa [#allocation4], 1 }

</bundles_post_ra>
